<compile_context>
chip_gen: v7x
topology: tpu7x:2x2x1
jax: 0.10.0
libtpu: 0.0.40
codegen_flags: <defaults>
</compile_context>

<pallas_src>
import functools

import jax
import jax.numpy as jnp
from jax.experimental import pallas as pl
from jax.experimental.pallas import tpu as pltpu


IN_F = 800       # fc1 in_features
HID = 500        # fc1 out_features / bn1_fc features
OUT = 10         # fc2 out_features
HID_PAD = 512    # 500 -> next multiple of 128
OUT_PAD = 128    # 10  -> next multiple of 128


def _round_up(x, m):
    return (x + m - 1) // m * m


def _choose_batch_tile(B):
    """Largest HBM-friendly batch tile that still leaves >= 2 grid steps for big batches.

    Keeping >= 2 tiles lets the ("parallel",) batch axis shard across v7x's two
    TensorCores; 512/1024-row tiles get much closer to the HBM roofline than 256
    and amortize the ~0.35 us per-grid-step overhead.
    """
    if B < 256:
        return _round_up(max(B, 8), 8)
    for tb in (1024, 512, 256):
        if B >= 2 * tb:
            return tb
    return 256


def predictor_kernel(x_ref, w1_ref, b1_ref, w2_ref, b2_ref, o_ref):
    # fc1 (+ folded BN):  (TB, 800)bf16 @ (800, 512)bf16 -> f32 acc, + bias
    x = x_ref[...].astype(jnp.bfloat16)
    h = jnp.dot(x, w1_ref[...], preferred_element_type=jnp.float32) + b1_ref[...]
    # relu
    h = jnp.maximum(h, 0.0)
    # fc2:  (TB, 512)bf16 @ (512, 128)bf16 -> f32 acc, + bias (lane-dense 128-wide store)
    o_ref[...] = (jnp.dot(h.astype(jnp.bfloat16), w2_ref[...],
                          preferred_element_type=jnp.float32)
                  + b2_ref[...]).astype(o_ref.dtype)


def _resident_spec(shape, buffered):
    # Weights/biases are pinned to block (0, 0): they never re-DMA across the grid.
    idx_map = lambda i: (0,) * len(shape)
    if buffered:
        # Single-buffer resident operands: default double-buffering only wastes VMEM
        # on blocks whose index never changes.
        return pl.BlockSpec(shape, idx_map, pipeline_mode=pl.Buffered(1))
    return pl.BlockSpec(shape, idx_map)


@functools.partial(jax.jit, static_argnames=("buffered_weights",))
def _predictor_forward_impl(x, packed, *, buffered_weights):
    w1, b1, w2, b2 = packed          # bf16 (800,512), f32 (1,512), bf16 (512,128), f32 (1,128)
    B = x.shape[0]

    TB = _choose_batch_tile(B)
    Bp = _round_up(B, TB)
    if Bp != B:
        x = jnp.pad(x, ((0, Bp - B), (0, 0)))
    n_tiles = Bp // TB

    flops = 2 * Bp * (IN_F * HID_PAD + HID_PAD * OUT_PAD)
    bytes_accessed = (Bp * IN_F * 4                                   # x (f32) read
                      + (IN_F * HID_PAD + HID_PAD * OUT_PAD) * 2      # bf16 weights
                      + (HID_PAD + OUT_PAD) * 4                       # f32 biases
                      + Bp * OUT_PAD * 4)                             # f32 output write

    out = pl.pallas_call(
        predictor_kernel,
        out_shape=jax.ShapeDtypeStruct((Bp, OUT_PAD), jnp.float32),
        grid_spec=pltpu.PrefetchScalarGridSpec(
            num_scalar_prefetch=0,
            grid=(n_tiles,),
            in_specs=[
                pl.BlockSpec((TB, IN_F), lambda i: (i, 0)),            # x: streamed tiles
                _resident_spec((IN_F, HID_PAD), buffered_weights),     # w1 (BN folded)
                _resident_spec((1, HID_PAD), buffered_weights),        # b1 (BN folded)
                _resident_spec((HID_PAD, OUT_PAD), buffered_weights),  # w2
                _resident_spec((1, OUT_PAD), buffered_weights),        # b2
            ],
            out_specs=pl.BlockSpec((TB, OUT_PAD), lambda i: (i, 0)),
        ),
        compiler_params=pltpu.CompilerParams(
            dimension_semantics=("parallel",),   # batch tiles shard across TCs on v7x
            vmem_limit_bytes=32 * 1024 * 1024,   # TB=1024 working set > v5e's 16 MiB default
        ),
        cost_estimate=pl.CostEstimate(flops=flops, transcendentals=0,
                                      bytes_accessed=bytes_accessed),
    )(x, w1, b1, w2, b2)

    # Strip batch and output-lane padding outside the kernel.
    return out[:B, :OUT]


def predictor_forward(x, packed):
    """x: (B, 800) float32 -> (B, 10) float32 (eval-mode Predictor forward)."""
    try:
        return _predictor_forward_impl(x, packed, buffered_weights=True)
    except Exception:
        # Fallback if this backend/jax version rejects pl.Buffered(1) single-buffering.
        return _predictor_forward_impl(x, packed, buffered_weights=False)


def init_torch_params(key):
    """Deterministic f32 params with the PyTorch module's shapes/semantics."""
    k = jax.random.split(key, 8)
    lim1 = 1.0 / jnp.sqrt(jnp.float32(IN_F))
    lim2 = 1.0 / jnp.sqrt(jnp.float32(HID))
    w1 = jax.random.uniform(k[0], (HID, IN_F), jnp.float32, -lim1, lim1)   # (500, 800)
    b1 = jax.random.uniform(k[1], (HID,), jnp.float32, -lim1, lim1)
    w2 = jax.random.uniform(k[2], (OUT, HID), jnp.float32, -lim2, lim2)    # (10, 500)
    b2 = jax.random.uniform(k[3], (OUT,), jnp.float32, -lim2, lim2)
    gamma = 1.0 + 0.1 * jax.random.normal(k[4], (HID,), jnp.float32)
    beta = 0.1 * jax.random.normal(k[5], (HID,), jnp.float32)
    running_mean = 0.1 * jax.random.normal(k[6], (HID,), jnp.float32)
    running_var = jnp.abs(1.0 + 0.1 * jax.random.normal(k[7], (HID,), jnp.float32))
    eps = jnp.float32(1e-5)
    return dict(w1=w1, b1=b1, w2=w2, b2=b2, gamma=gamma, beta=beta,
                running_mean=running_mean, running_var=running_var, eps=eps)


def pack_params(p):
    """Fold BN into fc1, pad feature dims to lane multiples, cast weights to bf16."""
    # BN eval affine: y = h * scale + shift
    scale = p["gamma"] / jnp.sqrt(p["running_var"] + p["eps"])          # (500,)
    shift = p["beta"] - p["running_mean"] * scale                       # (500,)

    # Fold into fc1 (x @ w1t + b1):  (x @ (w1t * scale)) + (b1 * scale + shift)
    w1t_folded = p["w1"].T * scale[None, :]                             # (800, 500)
    b1_folded = p["b1"] * scale + shift                                 # (500,)

    # Pad hidden 500 -> 512 (zero cols / zero bias -> relu gives exact zeros there).
    w1p = jnp.zeros((IN_F, HID_PAD), jnp.float32).at[:, :HID].set(w1t_folded)
    b1p = jnp.zeros((1, HID_PAD), jnp.float32).at[:, :HID].set(b1_folded)

    # Pad fc2: rows 500->512 and cols 10->128, all padding exactly zero.
    w2p = jnp.zeros((HID_PAD, OUT_PAD), jnp.float32).at[:HID, :OUT].set(p["w2"].T)
    b2p = jnp.zeros((1, OUT_PAD), jnp.float32).at[:, :OUT].set(p["b2"])

    return (w1p.astype(jnp.bfloat16), b1p,
            w2p.astype(jnp.bfloat16), b2p)


def reference_forward_f32(x, p):
    """Plain-JAX f32 reference matching the PyTorch eval-mode forward."""
    h = x @ p["w1"].T + p["b1"]
    h = (h - p["running_mean"]) / jnp.sqrt(p["running_var"] + p["eps"])
    h = h * p["gamma"] + p["beta"]
    h = jnp.maximum(h, 0.0)
    return h @ p["w2"].T + p["b2"]


if __name__ == "__main__":
    key = jax.random.PRNGKey(0)
    pkey, xkey = jax.random.split(key)

    raw = init_torch_params(pkey)
    packed = pack_params(raw)

    # Small-batch path (single tile) and multi-tile path (>= 2 grid steps).
    for B in (8, 512):
        x = jax.random.normal(jax.random.fold_in(xkey, B), (B, IN_F), jnp.float32)
        out = jax.block_until_ready(predictor_forward(x, packed))
        ref = reference_forward_f32(x, raw)
        assert out.shape == (B, OUT), out.shape
        # bf16 weights/activations => loose-ish tolerance vs the f32 reference.
        max_err = float(jnp.max(jnp.abs(out - ref)))
        assert jnp.allclose(out, ref, atol=3e-2, rtol=3e-2), (
            "B=%d mismatch vs reference: max abs err = %e" % (B, max_err))

    print("KERNEL_OK")
</pallas_src>

<mosaic_0001>
module attributes {stable_mosaic.version = 11 : i64} {
  func.func @predictor_kernel(%arg0: i32, %arg1: memref<8x800xf32, #tpu.memory_space<vmem>>, %arg2: memref<800x512xbf16, #tpu.memory_space<vmem>>, %arg3: memref<1x512xf32, #tpu.memory_space<vmem>>, %arg4: memref<512x128xbf16, #tpu.memory_space<vmem>>, %arg5: memref<1x128xf32, #tpu.memory_space<vmem>>, %arg6: memref<8x128xf32, #tpu.memory_space<vmem>>) attributes {dimension_semantics = [#tpu.dimension_semantics<parallel>], iteration_bounds = array<i64: 1>, scalar_prefetch = 0 : i64, scratch_operands = 0 : i64, tpu.core_type = #tpu.core_type<tc>, window_params = [{transform_indices = @transform_0, window_bounds = array<i64: 8, 800>}, {pipeline_mode = #tpu.pipeline_mode<synchronous>, transform_indices = @transform_1, window_bounds = array<i64: 800, 512>}, {pipeline_mode = #tpu.pipeline_mode<synchronous>, transform_indices = @transform_2, window_bounds = array<i64: 1, 512>}, {pipeline_mode = #tpu.pipeline_mode<synchronous>, transform_indices = @transform_3, window_bounds = array<i64: 512, 128>}, {pipeline_mode = #tpu.pipeline_mode<synchronous>, transform_indices = @transform_4, window_bounds = array<i64: 1, 128>}, {transform_indices = @transform_5, window_bounds = array<i64: 8, 128>}]} {
    %c0 = arith.constant 0 : index
    %c0_0 = arith.constant 0 : index
    %0 = vector.load %arg1[%c0, %c0_0] : memref<8x800xf32, #tpu.memory_space<vmem>>, vector<8x800xf32>
    %1 = arith.truncf %0 : vector<8x800xf32> to vector<8x800xbf16>
    %c0_1 = arith.constant 0 : index
    %c0_2 = arith.constant 0 : index
    %2 = vector.load %arg2[%c0_1, %c0_2] : memref<800x512xbf16, #tpu.memory_space<vmem>>, vector<800x512xbf16>
    %cst = arith.constant dense<0.000000e+00> : vector<8x512xf32>
    %3 = tpu.matmul %1, %2, %cst {dimension_numbers = #tpu.dot_dimension_numbers<[1], [0], [0], [1], [0, 0, 1, 1], [], []>} : vector<8x800xbf16>, vector<800x512xbf16>, vector<8x512xf32> -> vector<8x512xf32>
    %c0_3 = arith.constant 0 : index
    %c0_4 = arith.constant 0 : index
    %4 = vector.load %arg3[%c0_3, %c0_4] : memref<1x512xf32, #tpu.memory_space<vmem>>, vector<1x512xf32>
    %5 = vector.broadcast %4 : vector<1x512xf32> to vector<8x512xf32>
    %6 = arith.addf %3, %5 : vector<8x512xf32>
    %cst_5 = arith.constant 0.000000e+00 : f32
    %7 = vector.broadcast %cst_5 : f32 to vector<8x512xf32>
    %8 = arith.maximumf %6, %7 : vector<8x512xf32>
    %9 = arith.truncf %8 : vector<8x512xf32> to vector<8x512xbf16>
    %c0_6 = arith.constant 0 : index
    %c0_7 = arith.constant 0 : index
    %10 = vector.load %arg4[%c0_6, %c0_7] : memref<512x128xbf16, #tpu.memory_space<vmem>>, vector<512x128xbf16>
    %cst_8 = arith.constant dense<0.000000e+00> : vector<8x128xf32>
    %11 = tpu.matmul %9, %10, %cst_8 {dimension_numbers = #tpu.dot_dimension_numbers<[1], [0], [0], [1], [0, 0, 1, 1], [], []>} : vector<8x512xbf16>, vector<512x128xbf16>, vector<8x128xf32> -> vector<8x128xf32>
    %c0_9 = arith.constant 0 : index
    %c0_10 = arith.constant 0 : index
    %12 = vector.load %arg5[%c0_9, %c0_10] : memref<1x128xf32, #tpu.memory_space<vmem>>, vector<1x128xf32>
    %13 = vector.broadcast %12 : vector<1x128xf32> to vector<8x128xf32>
    %14 = arith.addf %11, %13 : vector<8x128xf32>
    %c0_11 = arith.constant 0 : index
    %c0_12 = arith.constant 0 : index
    %15 = vector.load %arg6[%c0_11, %c0_12] : memref<8x128xf32, #tpu.memory_space<vmem>>, vector<8x128xf32>
    tpu.vector_store %arg6[%c0_11, %c0_12], %14 {strides = array<i32>} : memref<8x128xf32, #tpu.memory_space<vmem>>, vector<8x128xf32>,
    return
  }
  func.func @transform_0(%arg0: i32) -> (i32, i32) {
    %c0_i32 = arith.constant 0 : i32
    %c0_i32_0 = arith.constant 0 : i32
    return %arg0, %c0_i32 : i32, i32
  }
  func.func @transform_1(%arg0: i32) -> (i32, i32) {
    %c0_i32 = arith.constant 0 : i32
    %c0_i32_0 = arith.constant 0 : i32
    %c0_i32_1 = arith.constant 0 : i32
    return %c0_i32, %c0_i32_0 : i32, i32
  }
  func.func @transform_2(%arg0: i32) -> (i32, i32) {
    %c0_i32 = arith.constant 0 : i32
    %c0_i32_0 = arith.constant 0 : i32
    %c0_i32_1 = arith.constant 0 : i32
    return %c0_i32, %c0_i32_0 : i32, i32
  }
  func.func @transform_3(%arg0: i32) -> (i32, i32) {
    %c0_i32 = arith.constant 0 : i32
    %c0_i32_0 = arith.constant 0 : i32
    %c0_i32_1 = arith.constant 0 : i32
    return %c0_i32, %c0_i32_0 : i32, i32
  }
  func.func @transform_4(%arg0: i32) -> (i32, i32) {
    %c0_i32 = arith.constant 0 : i32
    %c0_i32_0 = arith.constant 0 : i32
    %c0_i32_1 = arith.constant 0 : i32
    return %c0_i32, %c0_i32_0 : i32, i32
  }
  func.func @transform_5(%arg0: i32) -> (i32, i32) {
    %c0_i32 = arith.constant 0 : i32
    %c0_i32_0 = arith.constant 0 : i32
    return %arg0, %c0_i32 : i32, i32
  }
}

module attributes {stable_mosaic.version = 11 : i64} {
  func.func @predictor_kernel(%arg0: i32, %arg1: memref<8x800xf32, #tpu.memory_space<vmem>>, %arg2: memref<800x512xbf16, #tpu.memory_space<vmem>>, %arg3: memref<1x512xf32, #tpu.memory_space<vmem>>, %arg4: memref<512x128xbf16, #tpu.memory_space<vmem>>, %arg5: memref<1x128xf32, #tpu.memory_space<vmem>>, %arg6: memref<8x128xf32, #tpu.memory_space<vmem>>) attributes {dimension_semantics = [#tpu.dimension_semantics<parallel>], iteration_bounds = array<i64: 1>, scalar_prefetch = 0 : i64, scratch_operands = 0 : i64, tpu.core_type = #tpu.core_type<tc>, window_params = [{transform_indices = @transform_0, window_bounds = array<i64: 8, 800>}, {pipeline_mode = #tpu.pipeline_mode<synchronous>, transform_indices = @transform_1, window_bounds = array<i64: 800, 512>}, {pipeline_mode = #tpu.pipeline_mode<synchronous>, transform_indices = @transform_2, window_bounds = array<i64: 1, 512>}, {pipeline_mode = #tpu.pipeline_mode<synchronous>, transform_indices = @transform_3, window_bounds = array<i64: 512, 128>}, {pipeline_mode = #tpu.pipeline_mode<synchronous>, transform_indices = @transform_4, window_bounds = array<i64: 1, 128>}, {transform_indices = @transform_5, window_bounds = array<i64: 8, 128>}]} {
    %c0 = arith.constant 0 : index
    %c0_0 = arith.constant 0 : index
    %0 = vector.load %arg1[%c0, %c0_0] : memref<8x800xf32, #tpu.memory_space<vmem>>, vector<8x800xf32>
    %1 = arith.truncf %0 : vector<8x800xf32> to vector<8x800xbf16>
    %c0_1 = arith.constant 0 : index
    %c0_2 = arith.constant 0 : index
    %2 = vector.load %arg2[%c0_1, %c0_2] : memref<800x512xbf16, #tpu.memory_space<vmem>>, vector<800x512xbf16>
    %cst = arith.constant dense<0.000000e+00> : vector<8x512xf32>
    %3 = tpu.matmul %1, %2, %cst {dimension_numbers = #tpu.dot_dimension_numbers<[1], [0], [0], [1], [0, 0, 1, 1], [], []>} : vector<8x800xbf16>, vector<800x512xbf16>, vector<8x512xf32> -> vector<8x512xf32>
    %c0_3 = arith.constant 0 : index
    %c0_4 = arith.constant 0 : index
    %4 = vector.load %arg3[%c0_3, %c0_4] : memref<1x512xf32, #tpu.memory_space<vmem>>, vector<1x512xf32>
    %5 = vector.broadcast %4 : vector<1x512xf32> to vector<8x512xf32>
    %6 = arith.addf %3, %5 : vector<8x512xf32>
    %cst_5 = arith.constant 0.000000e+00 : f32
    %7 = vector.broadcast %cst_5 : f32 to vector<8x512xf32>
    %8 = arith.maximumf %6, %7 : vector<8x512xf32>
    %9 = arith.truncf %8 : vector<8x512xf32> to vector<8x512xbf16>
    %c0_6 = arith.constant 0 : index
    %c0_7 = arith.constant 0 : index
    %10 = vector.load %arg4[%c0_6, %c0_7] : memref<512x128xbf16, #tpu.memory_space<vmem>>, vector<512x128xbf16>
    %cst_8 = arith.constant dense<0.000000e+00> : vector<8x128xf32>
    %11 = tpu.matmul %9, %10, %cst_8 {dimension_numbers = #tpu.dot_dimension_numbers<[1], [0], [0], [1], [0, 0, 1, 1], [], []>} : vector<8x512xbf16>, vector<512x128xbf16>, vector<8x128xf32> -> vector<8x128xf32>
    %c0_9 = arith.constant 0 : index
    %c0_10 = arith.constant 0 : index
    %12 = vector.load %arg5[%c0_9, %c0_10] : memref<1x128xf32, #tpu.memory_space<vmem>>, vector<1x128xf32>
    %13 = vector.broadcast %12 : vector<1x128xf32> to vector<8x128xf32>
    %14 = arith.addf %11, %13 : vector<8x128xf32>
    %c0_11 = arith.constant 0 : index
    %c0_12 = arith.constant 0 : index
    %15 = vector.load %arg6[%c0_11, %c0_12] : memref<8x128xf32, #tpu.memory_space<vmem>>, vector<8x128xf32>
    tpu.vector_store %arg6[%c0_11, %c0_12], %14 {strides = array<i32>} : memref<8x128xf32, #tpu.memory_space<vmem>>, vector<8x128xf32>,
    return
  }
  func.func @transform_0(%arg0: i32) -> (i32, i32) {
    %c0_i32 = arith.constant 0 : i32
    %c0_i32_0 = arith.constant 0 : i32
    return %arg0, %c0_i32 : i32, i32
  }
  func.func @transform_1(%arg0: i32) -> (i32, i32) {
    %c0_i32 = arith.constant 0 : i32
    %c0_i32_0 = arith.constant 0 : i32
    %c0_i32_1 = arith.constant 0 : i32
    return %c0_i32, %c0_i32_0 : i32, i32
  }
  func.func @transform_2(%arg0: i32) -> (i32, i32) {
    %c0_i32 = arith.constant 0 : i32
    %c0_i32_0 = arith.constant 0 : i32
    %c0_i32_1 = arith.constant 0 : i32
    return %c0_i32, %c0_i32_0 : i32, i32
  }
  func.func @transform_3(%arg0: i32) -> (i32, i32) {
    %c0_i32 = arith.constant 0 : i32
    %c0_i32_0 = arith.constant 0 : i32
    %c0_i32_1 = arith.constant 0 : i32
    return %c0_i32, %c0_i32_0 : i32, i32
  }
  func.func @transform_4(%arg0: i32) -> (i32, i32) {
    %c0_i32 = arith.constant 0 : i32
    %c0_i32_0 = arith.constant 0 : i32
    %c0_i32_1 = arith.constant 0 : i32
    return %c0_i32, %c0_i32_0 : i32, i32
  }
  func.func @transform_5(%arg0: i32) -> (i32, i32) {
    %c0_i32 = arith.constant 0 : i32
    %c0_i32_0 = arith.constant 0 : i32
    return %arg0, %c0_i32 : i32, i32
  }
}

</mosaic_0001>

<bundles_post_ra>
// kernel: _predictor_forward_impl.1
= control target key start
LH: loop header
LB: loop body
LE: loop exit
PB: predicated region body
PF: predicated region fallthrough
CT: control target
= control target key end

     0   :  { %10 = vsyncpa [#allocation3], 0  ;;  %s2832_s0 = inlined_call_operand.hbm [shape: f32[8,800], index: 0, kind: input, shape index: {}]   ;;  %s2833_s1 = inlined_call_operand.hbm [shape: bf16[800,512], index: 1, kind: input, shape index: {}]   ;;  %s2834_s2 = inlined_call_operand.vmem [shape: f32[1,512], index: 2, kind: input, shape index: {}]   ;;  %s2835_s3 = inlined_call_operand.hbm [shape: bf16[512,128], index: 3, kind: input, shape index: {}]   ;;  %s2836_s4 = inlined_call_operand.vmem [shape: f32[1,128], index: 4, kind: input, shape index: {}]   ;;  %s2837_s5 = inlined_call_operand.hbm [shape: f32[8,128], index: 5, kind: output, shape index: {}]  }
   0x1   :  { %11 = vsyncpa [#allocation6], 0 }
   0x2   :  { %12 = vsyncpa [#allocation4], 0  ;;  %s2739_s18 = smov [#allocation5]   ;;  %s2645_s22 = scalar_lea.hbm %s2833_s1, 25600 }
   0x3   :  { %s28_s19 = sshll.u32 %s2739_s18, 4  ;;  %p2646_p0 = scmp.ne.s32.totalorder %s2833_s1, %s2645_s22  ;;  %s29_s19 = int_to_ptr.vmem [resolvable:$true] %s28_s19 }
   0x4   :  { %p2649_p1 = scmp.lt.u32.totalorder %s2645_s22, %s2833_s1 }
   0x6   :  { %p2651_p2 = pnand %p2649_p1, %p2646_p0 }
   0x8   :  { %2654 = shalt.err (!%p2651_p2)
}
   0x9   :  { %s2655_s27 = scalar_lea.vmem %s29_s19, 25600  ;;  %p2660_p4 = scmp.lt.s32.totalorder %s29_s19, %s29_s19 }
   0xa   :  { %p2656_p3 = scmp.ne.s32.totalorder %s29_s19, %s2655_s27  ;;  %p2661_p5 = scmp.lt.s32.totalorder %s2655_s27, %s2655_s27 }
   0xc   :  { %p2662_p6 = por %p2661_p5, %p2660_p4 }
   0xe   :  { %p2663_p7 = pnand %p2662_p6, %p2656_p3 }
  0x10   :  { %2666 = shalt.err (!%p2663_p7)
}
  0x11   :  { %s2740_s28 = smov 256   ;;  %s2741_s29 = smov 16  }
  0x12   :  { %34 = dma.hbm_to_vmem [thread:$0]  %s2833_s1, 25600, %s29_s19, [#allocation6], %s2740_s28, %s2740_s28, %s2741_s29  }
  0x13   :  { %s2742_s7 = smov [#allocation2]   ;;  %s2743_s9 = smov [#allocation7]  }
  0x14   :  { %s19_s8 = sshll.u32 %s2742_s7, 4  ;;  %s42_s10 = sshll.u32 %s2743_s9, 4  ;;  %s20_s8 = int_to_ptr.vmem [resolvable:$true] %s19_s8  ;;  %s43_s10 = int_to_ptr.vmem [resolvable:$true] %s42_s10 }
  0x15   :  { %s2667_s13 = scalar_lea.hbm %s2832_s0, 896 }
  0x16   :  { %p2668_p8 = scmp.ne.s32.totalorder %s2832_s0, %s2667_s13  ;;  %p2671_p9 = scmp.lt.u32.totalorder %s2667_s13, %s2832_s0 }
  0x18   :  { %p2673_p10 = pnand %p2671_p9, %p2668_p8 }
  0x1a   :  { %2676 = shalt.err (!%p2673_p10)
}
  0x1b   :  { %s2677_s1 = scalar_lea.vmem %s20_s8, 896  ;;  %p2682_p12 = scmp.lt.s32.totalorder %s20_s8, %s20_s8 }
  0x1c   :  { %p2678_p11 = scmp.ne.s32.totalorder %s20_s8, %s2677_s1  ;;  %p2683_p13 = scmp.lt.s32.totalorder %s2677_s1, %s2677_s1 }
  0x1e   :  { %p2684_p0 = por %p2683_p13, %p2682_p12 }
  0x20   :  { %p2685_p1 = pnand %p2684_p0, %p2678_p11 }
  0x22   :  { %2688 = shalt.err (!%p2685_p1)
}
  0x23   :  { %22 = dma.hbm_to_vmem [thread:$0]  %s2832_s0, 896, %s20_s8, [#allocation3]  }
  0x24   :  { %s2689_s22 = scalar_lea.hbm %s2835_s3, 4096 }
  0x25   :  { %p2690_p2 = scmp.ne.s32.totalorder %s2835_s3, %s2689_s22  ;;  %p2693_p3 = scmp.lt.u32.totalorder %s2689_s22, %s2835_s3 }
  0x27   :  { %p2695_p4 = pnand %p2693_p3, %p2690_p2 }
  0x29   :  { %2698 = shalt.err (!%p2695_p4)
}
  0x2a   :  { %s2699_s27 = scalar_lea.vmem %s43_s10, 4096  ;;  %p2704_p6 = scmp.lt.s32.totalorder %s43_s10, %s43_s10 }
  0x2b   :  { %p2700_p5 = scmp.ne.s32.totalorder %s43_s10, %s2699_s27  ;;  %p2705_p7 = scmp.lt.s32.totalorder %s2699_s27, %s2699_s27 }
  0x2d   :  { %p2706_p8 = por %p2705_p7, %p2704_p6 }
  0x2f   :  { %p2707_p9 = pnand %p2706_p8, %p2700_p5 }
  0x31   :  { %2710 = shalt.err (!%p2707_p9)
}
  0x32   :  { %s2744_s0 = smov 64   ;;  %s2745_s28 = smov 4  }
  0x33   :  { %48 = dma.hbm_to_vmem [thread:$0]  %s2835_s3, 4096, %s43_s10, [#allocation6], %s2744_s0, %s2744_s0, %s2745_s28  }
  0x34   :  { %2733 = dma.done.wait [#allocation3], 896  }
  0x35   :  { %2734 = vsyncadd [#allocation3], 4294966400 }
  0x36   :  { %2735 = dma.done.wait [#allocation6], 29696  }
  0x37   :  { %2736 = vsyncadd [#allocation6], 4294937600  ;;  %v2313_v0 = vld [vmem:[#allocation5 + $0x4] ss:$16 sps:$4 sm:$0xff]   ;;  %v2315_v1 = vld [vmem:[#allocation5 + $0xc] ss:$16 sps:$4 sm:$0xff]  }
  0x38   :  { %1301 = vmatprep.subr.bf16.mxu0 %v2313_v0  ;;  %v2317_v2 = vld [vmem:[#allocation5] ss:$16 sps:$4 sm:$0xff]   ;;  %v2318_v3 = vld [vmem:[#allocation5 + $0x8] ss:$16 sps:$4 sm:$0xff]   ;;  %1465 = vmatprep.subr.bf16.mxu1 %v2315_v1  ;;  %v2319_v4 = vld [vmem:[#allocation5 + $0x24] ss:$16 sps:$4 sm:$0xff]  }
  0x39   :  { %1302 = vmatpush1.bf16.msra.mxu0 %v2317_v2  ;;  %1466 = vmatpush1.bf16.msra.mxu1 %v2318_v3  ;;  %v2321_v5 = vld [vmem:[#allocation5 + $0x2c] ss:$16 sps:$4 sm:$0xff]   ;;  %v2323_v6 = vld [vmem:[#allocation5 + $0x20] ss:$16 sps:$4 sm:$0xff]   ;;  %v2324_v7 = vld [vmem:[#allocation5 + $0x28] ss:$16 sps:$4 sm:$0xff]  }
  0x3a   :  { %1303 = vmatprep.subr.bf16.mxu0 %v2319_v4  ;;  %1467 = vmatprep.subr.bf16.mxu1 %v2321_v5  ;;  %v2325_v8 = vld [vmem:[#allocation5 + $0x44] ss:$16 sps:$4 sm:$0xff]   ;;  %v2327_v9 = vld [vmem:[#allocation5 + $0x4c] ss:$16 sps:$4 sm:$0xff]   ;;  %v2329_v10 = vld [vmem:[#allocation5 + $0x40] ss:$16 sps:$4 sm:$0xff]  }
  0x3b   :  { %v2330_v11 = vld [vmem:[#allocation5 + $0x48] ss:$16 sps:$4 sm:$0xff]   ;;  %v2331_v12 = vld [vmem:[#allocation5 + $0x64] ss:$16 sps:$4 sm:$0xff]   ;;  %v2333_v13 = vld [vmem:[#allocation5 + $0x6c] ss:$16 sps:$4 sm:$0xff]  }
  0x3c   :  { %v2335_v14 = vld [vmem:[#allocation5 + $0x60] ss:$16 sps:$4 sm:$0xff]   ;;  %v2336_v15 = vld [vmem:[#allocation5 + $0x68] ss:$16 sps:$4 sm:$0xff]   ;;  %v2337_v16 = vld [vmem:[#allocation5 + $0x84] ss:$16 sps:$4 sm:$0xff]  }
  0x3d   :  { %1304 = vmatpush1.bf16.msra.mxu0 %v2323_v6  ;;  %1468 = vmatpush1.bf16.msra.mxu1 %v2324_v7  ;;  %v2339_v17 = vld [vmem:[#allocation5 + $0x8c] ss:$16 sps:$4 sm:$0xff]   ;;  %v2341_v18 = vld [vmem:[#allocation5 + $0x80] ss:$16 sps:$4 sm:$0xff]   ;;  %v2342_v19 = vld [vmem:[#allocation5 + $0x88] ss:$16 sps:$4 sm:$0xff]  }
  0x3e   :  { %1305 = vmatprep.subr.bf16.mxu0 %v2325_v8  ;;  %1469 = vmatprep.subr.bf16.mxu1 %v2327_v9  ;;  %v2343_v20 = vld [vmem:[#allocation5 + $0xa4] ss:$16 sps:$4 sm:$0xff]   ;;  %v2345_v21 = vld [vmem:[#allocation5 + $0xac] ss:$16 sps:$4 sm:$0xff]   ;;  %v2347_v22 = vld [vmem:[#allocation5 + $0xa0] ss:$16 sps:$4 sm:$0xff]  }
  0x3f   :  { %v2348_v23 = vld [vmem:[#allocation5 + $0xa8] ss:$16 sps:$4 sm:$0xff]   ;;  %v2349_v24 = vld [vmem:[#allocation5 + $0xc4] ss:$16 sps:$4 sm:$0xff]   ;;  %v2351_v25 = vld [vmem:[#allocation5 + $0xcc] ss:$16 sps:$4 sm:$0xff]  }
  0x40   :  { %v2353_v26 = vld [vmem:[#allocation5 + $0xc0] ss:$16 sps:$4 sm:$0xff]   ;;  %v2354_v27 = vld [vmem:[#allocation5 + $0xc8] ss:$16 sps:$4 sm:$0xff]   ;;  %v2355_v28 = vld [vmem:[#allocation5 + $0xe4] ss:$16 sps:$4 sm:$0xff]  }
  0x41   :  { %1306 = vmatpush1.bf16.msra.mxu0 %v2329_v10  ;;  %1470 = vmatpush1.bf16.msra.mxu1 %v2330_v11  ;;  %v2357_v29 = vld [vmem:[#allocation5 + $0xec] ss:$16 sps:$4 sm:$0xff]   ;;  %v2359_v30 = vld [vmem:[#allocation5 + $0xe0] ss:$16 sps:$4 sm:$0xff]   ;;  %v2360_v31 = vld [vmem:[#allocation5 + $0xe8] ss:$16 sps:$4 sm:$0xff]  }
  0x42   :  { %1307 = vmatprep.subr.bf16.mxu0 %v2331_v12  ;;  %1471 = vmatprep.subr.bf16.mxu1 %v2333_v13  ;;  %v2361_v32 = vld [vmem:[#allocation5 + $0x104] ss:$16 sps:$4 sm:$0xff]   ;;  %v2363_v33 = vld [vmem:[#allocation5 + $0x10c] ss:$16 sps:$4 sm:$0xff]   ;;  %v2365_v34 = vld [vmem:[#allocation5 + $0x100] ss:$16 sps:$4 sm:$0xff]  }
  0x43   :  { %v2366_v35 = vld [vmem:[#allocation5 + $0x108] ss:$16 sps:$4 sm:$0xff]   ;;  %v2367_v36 = vld [vmem:[#allocation5 + $0x124] ss:$16 sps:$4 sm:$0xff]   ;;  %v2369_v37 = vld [vmem:[#allocation5 + $0x12c] ss:$16 sps:$4 sm:$0xff]  }
  0x44   :  { %v2371_v38 = vld [vmem:[#allocation5 + $0x120] ss:$16 sps:$4 sm:$0xff]   ;;  %v2372_v39 = vld [vmem:[#allocation5 + $0x128] ss:$16 sps:$4 sm:$0xff]   ;;  %v2373_v40 = vld [vmem:[#allocation5 + $0x144] ss:$16 sps:$4 sm:$0xff]  }
  0x45   :  { %1308 = vmatpush1.bf16.msra.mxu0 %v2335_v14  ;;  %1472 = vmatpush1.bf16.msra.mxu1 %v2336_v15  ;;  %v2375_v41 = vld [vmem:[#allocation5 + $0x14c] ss:$16 sps:$4 sm:$0xff]   ;;  %v2377_v42 = vld [vmem:[#allocation5 + $0x140] ss:$16 sps:$4 sm:$0xff]   ;;  %v2378_v43 = vld [vmem:[#allocation5 + $0x148] ss:$16 sps:$4 sm:$0xff]  }
  0x46   :  { %1309 = vmatprep.subr.bf16.mxu0 %v2337_v16  ;;  %1473 = vmatprep.subr.bf16.mxu1 %v2339_v17  ;;  %v2379_v44 = vld [vmem:[#allocation5 + $0x164] ss:$16 sps:$4 sm:$0xff]   ;;  %v2381_v45 = vld [vmem:[#allocation5 + $0x16c] ss:$16 sps:$4 sm:$0xff]   ;;  %v2383_v47 = vld [vmem:[#allocation5 + $0x160] ss:$16 sps:$4 sm:$0xff]  }
  0x47   :  { %v62_v46 = vld [vmem:[#allocation2 + $0x8] sm:$0xff]  ;;  %v2384_v49 = vld [vmem:[#allocation5 + $0x168] ss:$16 sps:$4 sm:$0xff]   ;;  %v2387_v51 = vld [vmem:[#allocation5 + $0x18c] ss:$16 sps:$4 sm:$0xff]   ;;  %vm1297_vm0 = vcmask 261120  }
  0x48   :  { %v69_v48 = vpack.c.bf16 %v62_v46, %v62_v46  ;;  %v2385_v50 = vld [vmem:[#allocation5 + $0x184] ss:$16 sps:$4 sm:$0xff]   ;;  %v2389_v52 = vld [vmem:[#allocation5 + $0x180] ss:$16 sps:$4 sm:$0xff]   ;;  %v2390_v53 = vld [vmem:[#allocation5 + $0x188] ss:$16 sps:$4 sm:$0xff]  }
  0x49   :  { %1310 = vmatpush1.bf16.msra.mxu0 %v2341_v18  ;;  %1474 = vmatpush1.bf16.msra.mxu1 %v2342_v19  ;;  %v2391_v54 = vld [vmem:[#allocation5 + $0x1a4] ss:$16 sps:$4 sm:$0xff]   ;;  %v2393_v55 = vld [vmem:[#allocation5 + $0x1ac] ss:$16 sps:$4 sm:$0xff]   ;;  %v2395_v56 = vld [vmem:[#allocation5 + $0x1a0] ss:$16 sps:$4 sm:$0xff]  }
  0x4a   :  { %1311 = vmatprep.subr.bf16.mxu0 %v2343_v20  ;;  %1475 = vmatprep.subr.bf16.mxu1 %v2345_v21  ;;  %v2396_v57 = vld [vmem:[#allocation5 + $0x1a8] ss:$16 sps:$4 sm:$0xff]   ;;  %v2397_v58 = vld [vmem:[#allocation5 + $0x1c4] ss:$16 sps:$4 sm:$0xff]   ;;  %v2399_v59 = vld [vmem:[#allocation5 + $0x1cc] ss:$16 sps:$4 sm:$0xff]  }
  0x4b   :  { %1333 = vmatprep.mubr.bf16.mxu0 %v69_v48  ;;  %1497 = vmatprep.mubr.bf16.mxu1 %v69_v48  ;;  %v2401_v60 = vld [vmem:[#allocation5 + $0x1c0] ss:$16 sps:$4 sm:$0xff]   ;;  %v2402_v61 = vld [vmem:[#allocation5 + $0x1c8] ss:$16 sps:$4 sm:$0xff]   ;;  %v2403_v62 = vld [vmem:[#allocation5 + $0x1e4] ss:$16 sps:$4 sm:$0xff]  }
  0x4c   :  { %v2405_v63 = vld [vmem:[#allocation5 + $0x1ec] ss:$16 sps:$4 sm:$0xff]   ;;  %v2407_v0 = vld [vmem:[#allocation5 + $0x1e0] ss:$16 sps:$4 sm:$0xff]   ;;  %v2408_v1 = vld [vmem:[#allocation5 + $0x1e8] ss:$16 sps:$4 sm:$0xff]  }
  0x4d   :  { %1312 = vmatpush1.bf16.msra.mxu0 %v2347_v22  ;;  %1476 = vmatpush1.bf16.msra.mxu1 %v2348_v23  ;;  %v61_v2 = vld [vmem:[#allocation2] sm:$0xff]  ;;  %v2411_v3 = vld [vmem:[#allocation5 + $0x204] ss:$16 sps:$4 sm:$0xff]   ;;  %v2409_v6 = vld [vmem:[#allocation5 + $0x200] ss:$16 sps:$4 sm:$0xff]   ;;  %s2747_s8 = smov [#allocation8]  }
  0x4e   :  { %1313 = vmatprep.subr.bf16.mxu0 %v2349_v24  ;;  %1477 = vmatprep.subr.bf16.mxu1 %v2351_v25  ;;  %v2414_v4 = vld [vmem:[#allocation5 + $0x20c] ss:$16 sps:$4 sm:$0xff]   ;;  %v68_v5 = vpack.c.bf16 %v61_v2, %v61_v2  ;;  %v2412_v7 = vld [vmem:[#allocation5 + $0x208] ss:$16 sps:$4 sm:$0xff]   ;;  %v2417_v8 = vld [vmem:[#allocation5 + $0x224] ss:$16 sps:$4 sm:$0xff]  }
  0x4f   :  { %v2420_v9 = vld [vmem:[#allocation5 + $0x22c] ss:$16 sps:$4 sm:$0xff]   ;;  %v2415_v10 = vld [vmem:[#allocation5 + $0x220] ss:$16 sps:$4 sm:$0xff]   ;;  %v2418_v11 = vld [vmem:[#allocation5 + $0x228] ss:$16 sps:$4 sm:$0xff]  }
  0x50   :  { %v2423_v12 = vld [vmem:[#allocation5 + $0x244] ss:$16 sps:$4 sm:$0xff]   ;;  %v2426_v13 = vld [vmem:[#allocation5 + $0x24c] ss:$16 sps:$4 sm:$0xff]   ;;  %v2421_v14 = vld [vmem:[#allocation5 + $0x240] ss:$16 sps:$4 sm:$0xff]  }
  0x51   :  { %1314 = vmatpush1.bf16.msra.mxu0 %v2353_v26  ;;  %1478 = vmatpush1.bf16.msra.mxu1 %v2354_v27  ;;  %v2424_v15 = vld [vmem:[#allocation5 + $0x248] ss:$16 sps:$4 sm:$0xff]   ;;  %v2429_v16 = vld [vmem:[#allocation5 + $0x264] ss:$16 sps:$4 sm:$0xff]   ;;  %v2432_v17 = vld [vmem:[#allocation5 + $0x26c] ss:$16 sps:$4 sm:$0xff]  }
  0x52   :  { %1315 = vmatprep.subr.bf16.mxu0 %v2355_v28  ;;  %1479 = vmatprep.subr.bf16.mxu1 %v2357_v29  ;;  %v2427_v18 = vld [vmem:[#allocation5 + $0x260] ss:$16 sps:$4 sm:$0xff]   ;;  %v2430_v19 = vld [vmem:[#allocation5 + $0x268] ss:$16 sps:$4 sm:$0xff]   ;;  %v2435_v20 = vld [vmem:[#allocation5 + $0x284] ss:$16 sps:$4 sm:$0xff]  }
  0x53   :  { %v2438_v21 = vld [vmem:[#allocation5 + $0x28c] ss:$16 sps:$4 sm:$0xff]   ;;  %v2433_v22 = vld [vmem:[#allocation5 + $0x280] ss:$16 sps:$4 sm:$0xff]   ;;  %v2436_v23 = vld [vmem:[#allocation5 + $0x288] ss:$16 sps:$4 sm:$0xff]  }
  0x54   :  { %v2441_v24 = vld [vmem:[#allocation5 + $0x2a4] ss:$16 sps:$4 sm:$0xff]   ;;  %v2444_v25 = vld [vmem:[#allocation5 + $0x2ac] ss:$16 sps:$4 sm:$0xff]   ;;  %v2439_v26 = vld [vmem:[#allocation5 + $0x2a0] ss:$16 sps:$4 sm:$0xff]  }
  0x55   :  { %1316 = vmatpush1.bf16.msra.mxu0 %v2359_v30  ;;  %1480 = vmatpush1.bf16.msra.mxu1 %v2360_v31  ;;  %v2442_v27 = vld [vmem:[#allocation5 + $0x2a8] ss:$16 sps:$4 sm:$0xff]   ;;  %v2447_v28 = vld [vmem:[#allocation5 + $0x2c4] ss:$16 sps:$4 sm:$0xff]   ;;  %v2450_v29 = vld [vmem:[#allocation5 + $0x2cc] ss:$16 sps:$4 sm:$0xff]  }
  0x56   :  { %1317 = vmatprep.subr.bf16.mxu0 %v2361_v32  ;;  %1481 = vmatprep.subr.bf16.mxu1 %v2363_v33  ;;  %v64_v30 = vld [vmem:[#allocation2 + $0x18] sm:$0xff]  ;;  %v2448_v33 = vld [vmem:[#allocation5 + $0x2c8] ss:$16 sps:$4 sm:$0xff]   ;;  %s1987_s9 = sshll.u32 %s2747_s8, 4  ;;  %s1988_s9 = int_to_ptr.vmem [resolvable:$true] %s1987_s9 }
  0x57   :  { %v2445_v31 = vld [vmem:[#allocation5 + $0x2c0] ss:$16 sps:$4 sm:$0xff]   ;;  %v71_v32 = vpack.c.bf16 %v64_v30, %v64_v30  ;;  %v2471_v46 = vld [vmem:[#allocation5 + $0x344] ss:$16 sps:$4 sm:$0xff]   ;;  %s2711_s10 = scalar_lea.vmem %s1988_s9, 128  ;;  %p2716_p11 = scmp.lt.s32.totalorder %s1988_s9, %s1988_s9 }
  0x58   :  { %v2469_v48 = vld [vmem:[#allocation5 + $0x340] ss:$16 sps:$4 sm:$0xff]   ;;  %v2501_v2 = vld [vmem:[#allocation5 + $0x3e4] ss:$16 sps:$4 sm:$0xff]   ;;  %p2712_p10 = scmp.ne.s32.totalorder %s1988_s9, %s2711_s10  ;;  %p2717_p12 = scmp.lt.s32.totalorder %s2711_s10, %s2711_s10 }
  0x59   :  { %1318 = vmatpush1.bf16.msra.mxu0 %v2365_v34  ;;  %1482 = vmatpush1.bf16.msra.mxu1 %v2366_v35  ;;  %v2453_v34 = vld [vmem:[#allocation5 + $0x2e4] ss:$16 sps:$4 sm:$0xff]   ;;  %v2456_v35 = vld [vmem:[#allocation5 + $0x2ec] ss:$16 sps:$4 sm:$0xff]  }
  0x5a   :  { %1319 = vmatprep.subr.bf16.mxu0 %v2367_v36  ;;  %1483 = vmatprep.subr.bf16.mxu1 %v2369_v37  ;;  %v2451_v36 = vld [vmem:[#allocation5 + $0x2e0] ss:$16 sps:$4 sm:$0xff]   ;;  %v2454_v37 = vld [vmem:[#allocation5 + $0x2e8] ss:$16 sps:$4 sm:$0xff]   ;;  %v2537_v30 = vld [vmem:[#allocation5 + $0x4a4] ss:$16 sps:$4 sm:$0xff]   ;;  %p2718_p13 = por %p2717_p12, %p2716_p11 }
  0x5c   :  { %p2719_p0 = pnand %p2718_p13, %p2712_p10 }
  0x5d   :  { %1320 = vmatpush1.bf16.msra.mxu0 %v2371_v38  ;;  %1484 = vmatpush1.bf16.msra.mxu1 %v2372_v39  ;;  %v2459_v38 = vld [vmem:[#allocation5 + $0x304] ss:$16 sps:$4 sm:$0xff]   ;;  %v2462_v39 = vld [vmem:[#allocation5 + $0x30c] ss:$16 sps:$4 sm:$0xff]  }
  0x5e   :  { %1321 = vmatprep.subr.bf16.mxu0 %v2373_v40  ;;  %1485 = vmatprep.subr.bf16.mxu1 %v2375_v41  ;;  %v2457_v40 = vld [vmem:[#allocation5 + $0x300] ss:$16 sps:$4 sm:$0xff]   ;;  %v2460_v41 = vld [vmem:[#allocation5 + $0x308] ss:$16 sps:$4 sm:$0xff]  }
  0x61   :  { %1322 = vmatpush1.bf16.msra.mxu0 %v2377_v42  ;;  %1486 = vmatpush1.bf16.msra.mxu1 %v2378_v43  ;;  %v2465_v42 = vld [vmem:[#allocation5 + $0x324] ss:$16 sps:$4 sm:$0xff]   ;;  %v2468_v43 = vld [vmem:[#allocation5 + $0x32c] ss:$16 sps:$4 sm:$0xff]  }
  0x62   :  { %1323 = vmatprep.subr.bf16.mxu0 %v2379_v44  ;;  %1487 = vmatprep.subr.bf16.mxu1 %v2381_v45  ;;  %v2463_v44 = vld [vmem:[#allocation5 + $0x320] ss:$16 sps:$4 sm:$0xff]   ;;  %v2466_v45 = vld [vmem:[#allocation5 + $0x328] ss:$16 sps:$4 sm:$0xff]  }
  0x65   :  { %1324 = vmatpush1.bf16.msra.mxu0 %v2383_v47  ;;  %1488 = vmatpush1.bf16.msra.mxu1 %v2384_v49  ;;  %v2474_v47 = vld [vmem:[#allocation5 + $0x34c] ss:$16 sps:$4 sm:$0xff]   ;;  %v2472_v49 = vld [vmem:[#allocation5 + $0x348] ss:$16 sps:$4 sm:$0xff]  }
  0x66   :  { %1325 = vmatprep.subr.bf16.mxu0 %v2385_v50  ;;  %1489 = vmatprep.subr.bf16.mxu1 %v2387_v51  ;;  %v2477_v50 = vld [vmem:[#allocation5 + $0x364] ss:$16 sps:$4 sm:$0xff]   ;;  %v2480_v51 = vld [vmem:[#allocation5 + $0x36c] ss:$16 sps:$4 sm:$0xff]  }
  0x69   :  { %1326 = vmatpush1.bf16.msra.mxu0 %v2389_v52  ;;  %1490 = vmatpush1.bf16.msra.mxu1 %v2390_v53  ;;  %v2475_v52 = vld [vmem:[#allocation5 + $0x360] ss:$16 sps:$4 sm:$0xff]   ;;  %v2478_v53 = vld [vmem:[#allocation5 + $0x368] ss:$16 sps:$4 sm:$0xff]  }
  0x6a   :  { %1327 = vmatprep.subr.bf16.mxu0 %v2391_v54  ;;  %1491 = vmatprep.subr.bf16.mxu1 %v2393_v55  ;;  %v2483_v54 = vld [vmem:[#allocation5 + $0x384] ss:$16 sps:$4 sm:$0xff]   ;;  %v2486_v55 = vld [vmem:[#allocation5 + $0x38c] ss:$16 sps:$4 sm:$0xff]  }
  0x6d   :  { %1328 = vmatpush1.bf16.msra.mxu0 %v2395_v56  ;;  %1492 = vmatpush1.bf16.msra.mxu1 %v2396_v57  ;;  %v2481_v56 = vld [vmem:[#allocation5 + $0x380] ss:$16 sps:$4 sm:$0xff]   ;;  %v2484_v57 = vld [vmem:[#allocation5 + $0x388] ss:$16 sps:$4 sm:$0xff]  }
  0x6e   :  { %1329 = vmatprep.subr.bf16.mxu0 %v2397_v58  ;;  %1493 = vmatprep.subr.bf16.mxu1 %v2399_v59  ;;  %v2489_v58 = vld [vmem:[#allocation5 + $0x3a4] ss:$16 sps:$4 sm:$0xff]   ;;  %v2492_v59 = vld [vmem:[#allocation5 + $0x3ac] ss:$16 sps:$4 sm:$0xff]  }
  0x71   :  { %1330 = vmatpush1.bf16.msra.mxu0 %v2401_v60  ;;  %1494 = vmatpush1.bf16.msra.mxu1 %v2402_v61  ;;  %v2487_v60 = vld [vmem:[#allocation5 + $0x3a0] ss:$16 sps:$4 sm:$0xff]   ;;  %v2490_v61 = vld [vmem:[#allocation5 + $0x3a8] ss:$16 sps:$4 sm:$0xff]  }
  0x72   :  { %1331 = vmatprep.subr.bf16.mxu0 %v2403_v62  ;;  %1495 = vmatprep.subr.bf16.mxu1 %v2405_v63  ;;  %v2495_v62 = vld [vmem:[#allocation5 + $0x3c4] ss:$16 sps:$4 sm:$0xff]   ;;  %v2498_v63 = vld [vmem:[#allocation5 + $0x3cc] ss:$16 sps:$4 sm:$0xff]  }
  0x75   :  { %1332 = vmatpush1.bf16.msra.mxu0 %v2407_v0  ;;  %1496 = vmatpush1.bf16.msra.mxu1 %v2408_v1  ;;  %v2493_v0 = vld [vmem:[#allocation5 + $0x3c0] ss:$16 sps:$4 sm:$0xff]   ;;  %v2496_v1 = vld [vmem:[#allocation5 + $0x3c8] ss:$16 sps:$4 sm:$0xff]  }
  0x76   :  { %1342 = vmatprep.subr.bf16.mxu0 %v2411_v3  ;;  %1506 = vmatprep.subr.bf16.mxu1 %v2414_v4  ;;  %v2504_v3 = vld [vmem:[#allocation5 + $0x3ec] ss:$16 sps:$4 sm:$0xff]   ;;  %v2499_v4 = vld [vmem:[#allocation5 + $0x3e0] ss:$16 sps:$4 sm:$0xff]  }
  0x78   :  { %1334 = vmatmul.mubr.bf16.vlgmr.msra.gmra.mrb[0].mxu0 %v68_v5  ;;  %1498 = vmatmul.mubr.bf16.vlgmr.msra.gmra.mrb[0].mxu1 %v68_v5  ;;  %v2502_v5 = vld [vmem:[#allocation5 + $0x3e8] ss:$16 sps:$4 sm:$0xff]  }
  0x79   :  { %1343 = vmatpush1.bf16.msra.mxu0 %v2409_v6  ;;  %1507 = vmatpush1.bf16.msra.mxu1 %v2412_v7  ;;  %v2507_v6 = vld [vmem:[#allocation5 + $0x404] ss:$16 sps:$4 sm:$0xff]   ;;  %v63_v7 = vld [vmem:[#allocation2 + $0x10] sm:$0xff] }
  0x7a   :  { %1344 = vmatprep.subr.bf16.mxu0 %v2417_v8  ;;  %1508 = vmatprep.subr.bf16.mxu1 %v2420_v9  ;;  %v2510_v8 = vld [vmem:[#allocation5 + $0x40c] ss:$16 sps:$4 sm:$0xff]   ;;  %v2505_v9 = vld [vmem:[#allocation5 + $0x400] ss:$16 sps:$4 sm:$0xff]  }
  0x7b   :  { %1374 = vmatprep.mubr.bf16.mxu0 %v71_v32  ;;  %1538 = vmatprep.mubr.bf16.mxu1 %v71_v32  ;;  %v2535_v32 = vld [vmem:[#allocation5 + $0x4a0] ss:$16 sps:$4 sm:$0xff]  }
  0x7d   :  { %1345 = vmatpush1.bf16.msra.mxu0 %v2415_v10  ;;  %1509 = vmatpush1.bf16.msra.mxu1 %v2418_v11  ;;  %v70_v10 = vpack.c.bf16 %v63_v7, %v63_v7  ;;  %v2508_v11 = vld [vmem:[#allocation5 + $0x408] ss:$16 sps:$4 sm:$0xff]   ;;  %v2600_v7 = vld [vmem:[#allocation5 + $0x5ec] ss:$16 sps:$4 sm:$0xff]  }
  0x7e   :  { %1346 = vmatprep.subr.bf16.mxu0 %v2423_v12  ;;  %1510 = vmatprep.subr.bf16.mxu1 %v2426_v13  ;;  %v2513_v12 = vld [vmem:[#allocation5 + $0x424] ss:$16 sps:$4 sm:$0xff]   ;;  %v2516_v13 = vld [vmem:[#allocation5 + $0x42c] ss:$16 sps:$4 sm:$0xff]  }
  0x81   :  { %1347 = vmatpush1.bf16.msra.mxu0 %v2421_v14  ;;  %1511 = vmatpush1.bf16.msra.mxu1 %v2424_v15  ;;  %v66_v14 = vld [vmem:[#allocation2 + $0x28] sm:$0xff] }
  0x82   :  { %1348 = vmatprep.subr.bf16.mxu0 %v2429_v16  ;;  %1512 = vmatprep.subr.bf16.mxu1 %v2432_v17  ;;  %v73_v15 = vpack.c.bf16 %v66_v14, %v66_v14  ;;  %v2511_v16 = vld [vmem:[#allocation5 + $0x420] ss:$16 sps:$4 sm:$0xff]   ;;  %v2514_v17 = vld [vmem:[#allocation5 + $0x428] ss:$16 sps:$4 sm:$0xff]  }
  0x83   :  { %v2601_v14 = vld [vmem:[#allocation5 + $0x600] ss:$16 sps:$4 sm:$0xff]  }
  0x85   :  { %1349 = vmatpush1.bf16.msra.mxu0 %v2427_v18  ;;  %1513 = vmatpush1.bf16.msra.mxu1 %v2430_v19  ;;  %v2519_v18 = vld [vmem:[#allocation5 + $0x444] ss:$16 sps:$4 sm:$0xff]   ;;  %v2522_v19 = vld [vmem:[#allocation5 + $0x44c] ss:$16 sps:$4 sm:$0xff]  }
  0x86   :  { %1350 = vmatprep.subr.bf16.mxu0 %v2435_v20  ;;  %1514 = vmatprep.subr.bf16.mxu1 %v2438_v21  ;;  %v2517_v20 = vld [vmem:[#allocation5 + $0x440] ss:$16 sps:$4 sm:$0xff]   ;;  %v2520_v21 = vld [vmem:[#allocation5 + $0x448] ss:$16 sps:$4 sm:$0xff]  }
  0x89   :  { %1351 = vmatpush1.bf16.msra.mxu0 %v2433_v22  ;;  %1515 = vmatpush1.bf16.msra.mxu1 %v2436_v23  ;;  %v2525_v22 = vld [vmem:[#allocation5 + $0x464] ss:$16 sps:$4 sm:$0xff]   ;;  %v2528_v23 = vld [vmem:[#allocation5 + $0x46c] ss:$16 sps:$4 sm:$0xff]  }
  0x8a   :  { %1352 = vmatprep.subr.bf16.mxu0 %v2441_v24  ;;  %1516 = vmatprep.subr.bf16.mxu1 %v2444_v25  ;;  %v2523_v24 = vld [vmem:[#allocation5 + $0x460] ss:$16 sps:$4 sm:$0xff]   ;;  %v2526_v25 = vld [vmem:[#allocation5 + $0x468] ss:$16 sps:$4 sm:$0xff]  }
  0x8d   :  { %1353 = vmatpush1.bf16.msra.mxu0 %v2439_v26  ;;  %1517 = vmatpush1.bf16.msra.mxu1 %v2442_v27  ;;  %v2531_v26 = vld [vmem:[#allocation5 + $0x484] ss:$16 sps:$4 sm:$0xff]   ;;  %v2534_v27 = vld [vmem:[#allocation5 + $0x48c] ss:$16 sps:$4 sm:$0xff]  }
  0x8e   :  { %1354 = vmatprep.subr.bf16.mxu0 %v2447_v28  ;;  %1518 = vmatprep.subr.bf16.mxu1 %v2450_v29  ;;  %v2529_v28 = vld [vmem:[#allocation5 + $0x480] ss:$16 sps:$4 sm:$0xff]   ;;  %v2532_v29 = vld [vmem:[#allocation5 + $0x488] ss:$16 sps:$4 sm:$0xff]  }
  0x91   :  { %1355 = vmatpush1.bf16.msra.mxu0 %v2445_v31  ;;  %1519 = vmatpush1.bf16.msra.mxu1 %v2448_v33  ;;  %v2540_v31 = vld [vmem:[#allocation5 + $0x4ac] ss:$16 sps:$4 sm:$0xff]   ;;  %v2538_v33 = vld [vmem:[#allocation5 + $0x4a8] ss:$16 sps:$4 sm:$0xff]  }
  0x92   :  { %1356 = vmatprep.subr.bf16.mxu0 %v2453_v34  ;;  %1520 = vmatprep.subr.bf16.mxu1 %v2456_v35  ;;  %v2543_v34 = vld [vmem:[#allocation5 + $0x4c4] ss:$16 sps:$4 sm:$0xff]   ;;  %v2546_v35 = vld [vmem:[#allocation5 + $0x4cc] ss:$16 sps:$4 sm:$0xff]  }
  0x95   :  { %1357 = vmatpush1.bf16.msra.mxu0 %v2451_v36  ;;  %1521 = vmatpush1.bf16.msra.mxu1 %v2454_v37  ;;  %v2541_v36 = vld [vmem:[#allocation5 + $0x4c0] ss:$16 sps:$4 sm:$0xff]   ;;  %v2544_v37 = vld [vmem:[#allocation5 + $0x4c8] ss:$16 sps:$4 sm:$0xff]  }
  0x96   :  { %1358 = vmatprep.subr.bf16.mxu0 %v2459_v38  ;;  %1522 = vmatprep.subr.bf16.mxu1 %v2462_v39  ;;  %v2549_v38 = vld [vmem:[#allocation5 + $0x4e4] ss:$16 sps:$4 sm:$0xff]   ;;  %v2552_v39 = vld [vmem:[#allocation5 + $0x4ec] ss:$16 sps:$4 sm:$0xff]  }
  0x99   :  { %1359 = vmatpush1.bf16.msra.mxu0 %v2457_v40  ;;  %1523 = vmatpush1.bf16.msra.mxu1 %v2460_v41  ;;  %v2547_v40 = vld [vmem:[#allocation5 + $0x4e0] ss:$16 sps:$4 sm:$0xff]   ;;  %v2550_v41 = vld [vmem:[#allocation5 + $0x4e8] ss:$16 sps:$4 sm:$0xff]  }
  0x9a   :  { %1360 = vmatprep.subr.bf16.mxu0 %v2465_v42  ;;  %1524 = vmatprep.subr.bf16.mxu1 %v2468_v43  ;;  %v2555_v42 = vld [vmem:[#allocation5 + $0x504] ss:$16 sps:$4 sm:$0xff]   ;;  %v2558_v43 = vld [vmem:[#allocation5 + $0x50c] ss:$16 sps:$4 sm:$0xff]  }
  0x9d   :  { %1361 = vmatpush1.bf16.msra.mxu0 %v2463_v44  ;;  %1525 = vmatpush1.bf16.msra.mxu1 %v2466_v45  ;;  %v2553_v44 = vld [vmem:[#allocation5 + $0x500] ss:$16 sps:$4 sm:$0xff]   ;;  %v2556_v45 = vld [vmem:[#allocation5 + $0x508] ss:$16 sps:$4 sm:$0xff]  }
  0x9e   :  { %1362 = vmatprep.subr.bf16.mxu0 %v2471_v46  ;;  %1526 = vmatprep.subr.bf16.mxu1 %v2474_v47  ;;  %v2561_v46 = vld [vmem:[#allocation5 + $0x524] ss:$16 sps:$4 sm:$0xff]   ;;  %v2564_v47 = vld [vmem:[#allocation5 + $0x52c] ss:$16 sps:$4 sm:$0xff]  }
  0xa1   :  { %1363 = vmatpush1.bf16.msra.mxu0 %v2469_v48  ;;  %1527 = vmatpush1.bf16.msra.mxu1 %v2472_v49  ;;  %v2559_v48 = vld [vmem:[#allocation5 + $0x520] ss:$16 sps:$4 sm:$0xff]   ;;  %v2562_v49 = vld [vmem:[#allocation5 + $0x528] ss:$16 sps:$4 sm:$0xff]  }
  0xa2   :  { %1364 = vmatprep.subr.bf16.mxu0 %v2477_v50  ;;  %1528 = vmatprep.subr.bf16.mxu1 %v2480_v51  ;;  %v2567_v50 = vld [vmem:[#allocation5 + $0x544] ss:$16 sps:$4 sm:$0xff]   ;;  %v2570_v51 = vld [vmem:[#allocation5 + $0x54c] ss:$16 sps:$4 sm:$0xff]  }
  0xa5   :  { %1365 = vmatpush1.bf16.msra.mxu0 %v2475_v52  ;;  %1529 = vmatpush1.bf16.msra.mxu1 %v2478_v53  ;;  %v2565_v52 = vld [vmem:[#allocation5 + $0x540] ss:$16 sps:$4 sm:$0xff]   ;;  %v2568_v53 = vld [vmem:[#allocation5 + $0x548] ss:$16 sps:$4 sm:$0xff]  }
  0xa6   :  { %1366 = vmatprep.subr.bf16.mxu0 %v2483_v54  ;;  %1530 = vmatprep.subr.bf16.mxu1 %v2486_v55  ;;  %v2573_v54 = vld [vmem:[#allocation5 + $0x564] ss:$16 sps:$4 sm:$0xff]   ;;  %v2576_v55 = vld [vmem:[#allocation5 + $0x56c] ss:$16 sps:$4 sm:$0xff]  }
  0xa9   :  { %1367 = vmatpush1.bf16.msra.mxu0 %v2481_v56  ;;  %1531 = vmatpush1.bf16.msra.mxu1 %v2484_v57  ;;  %v2571_v56 = vld [vmem:[#allocation5 + $0x560] ss:$16 sps:$4 sm:$0xff]   ;;  %v2574_v57 = vld [vmem:[#allocation5 + $0x568] ss:$16 sps:$4 sm:$0xff]  }
  0xaa   :  { %1368 = vmatprep.subr.bf16.mxu0 %v2489_v58  ;;  %1532 = vmatprep.subr.bf16.mxu1 %v2492_v59  ;;  %v2579_v58 = vld [vmem:[#allocation5 + $0x584] ss:$16 sps:$4 sm:$0xff]   ;;  %v2582_v59 = vld [vmem:[#allocation5 + $0x58c] ss:$16 sps:$4 sm:$0xff]  }
  0xad   :  { %1369 = vmatpush1.bf16.msra.mxu0 %v2487_v60  ;;  %1533 = vmatpush1.bf16.msra.mxu1 %v2490_v61  ;;  %v2577_v60 = vld [vmem:[#allocation5 + $0x580] ss:$16 sps:$4 sm:$0xff]   ;;  %v2580_v61 = vld [vmem:[#allocation5 + $0x588] ss:$16 sps:$4 sm:$0xff]  }
  0xae   :  { %1370 = vmatprep.subr.bf16.mxu0 %v2495_v62  ;;  %1534 = vmatprep.subr.bf16.mxu1 %v2498_v63  ;;  %v2585_v62 = vld [vmem:[#allocation5 + $0x5a4] ss:$16 sps:$4 sm:$0xff]   ;;  %v2588_v63 = vld [vmem:[#allocation5 + $0x5ac] ss:$16 sps:$4 sm:$0xff]  }
  0xb1   :  { %1371 = vmatpush1.bf16.msra.mxu0 %v2493_v0  ;;  %1535 = vmatpush1.bf16.msra.mxu1 %v2496_v1  ;;  %v2583_v0 = vld [vmem:[#allocation5 + $0x5a0] ss:$16 sps:$4 sm:$0xff]   ;;  %v2586_v1 = vld [vmem:[#allocation5 + $0x5a8] ss:$16 sps:$4 sm:$0xff]  }
  0xb2   :  { %1372 = vmatprep.subr.bf16.mxu0 %v2501_v2  ;;  %1536 = vmatprep.subr.bf16.mxu1 %v2504_v3  ;;  %v2591_v2 = vld [vmem:[#allocation5 + $0x5c4] ss:$16 sps:$4 sm:$0xff]   ;;  %v2594_v3 = vld [vmem:[#allocation5 + $0x5cc] ss:$16 sps:$4 sm:$0xff]  }
  0xb5   :  { %1373 = vmatpush1.bf16.msra.mxu0 %v2499_v4  ;;  %1537 = vmatpush1.bf16.msra.mxu1 %v2502_v5  ;;  %v2589_v4 = vld [vmem:[#allocation5 + $0x5c0] ss:$16 sps:$4 sm:$0xff]   ;;  %v2592_v5 = vld [vmem:[#allocation5 + $0x5c8] ss:$16 sps:$4 sm:$0xff]  }
  0xb6   :  { %1383 = vmatprep.subr.bf16.mxu0 %v2507_v6  ;;  %1547 = vmatprep.subr.bf16.mxu1 %v2510_v8  ;;  %v2597_v6 = vld [vmem:[#allocation5 + $0x5e4] ss:$16 sps:$4 sm:$0xff]   ;;  %v2595_v8 = vld [vmem:[#allocation5 + $0x5e0] ss:$16 sps:$4 sm:$0xff]  }
  0xb8   :  { %1375 = vmatmul.mubr.bf16.vlgmr.msra.gmra.mrb[0].mxu0 %v70_v10  ;;  %1539 = vmatmul.mubr.bf16.vlgmr.msra.gmra.mrb[0].mxu1 %v70_v10  ;;  %v65_v10 = vld [vmem:[#allocation2 + $0x20] sm:$0xff] }
  0xb9   :  { %1384 = vmatpush1.bf16.msra.mxu0 %v2505_v9  ;;  %1548 = vmatpush1.bf16.msra.mxu1 %v2508_v11  ;;  %v2598_v9 = vld [vmem:[#allocation5 + $0x5e8] ss:$16 sps:$4 sm:$0xff]   ;;  %v2603_v11 = vld [vmem:[#allocation5 + $0x604] ss:$16 sps:$4 sm:$0xff]  }
  0xba   :  { %1385 = vmatprep.subr.bf16.mxu0 %v2513_v12  ;;  %1549 = vmatprep.subr.bf16.mxu1 %v2516_v13  ;;  %v2606_v12 = vld [vmem:[#allocation5 + $0x60c] ss:$16 sps:$4 sm:$0xff]   ;;  %v72_v13 = vpack.c.bf16 %v65_v10, %v65_v10 }
  0xbb   :  { %1415 = vmatprep.mubr.bf16.mxu0 %v73_v15  ;;  %1579 = vmatprep.mubr.bf16.mxu1 %v73_v15  ;;  %v2604_v15 = vld [vmem:[#allocation5 + $0x608] ss:$16 sps:$4 sm:$0xff]  }
  0xbd   :  { %1386 = vmatpush1.bf16.msra.mxu0 %v2511_v16  ;;  %1550 = vmatpush1.bf16.msra.mxu1 %v2514_v17  ;;  %v2609_v16 = vld [vmem:[#allocation5 + $0x624] ss:$16 sps:$4 sm:$0xff]   ;;  %v2612_v17 = vld [vmem:[#allocation5 + $0x62c] ss:$16 sps:$4 sm:$0xff]  }
  0xbe   :  { %1387 = vmatprep.subr.bf16.mxu0 %v2519_v18  ;;  %1551 = vmatprep.subr.bf16.mxu1 %v2522_v19  ;;  %v2607_v18 = vld [vmem:[#allocation5 + $0x620] ss:$16 sps:$4 sm:$0xff]   ;;  %v2610_v19 = vld [vmem:[#allocation5 + $0x628] ss:$16 sps:$4 sm:$0xff]  }
  0xc1   :  { %1388 = vmatpush1.bf16.msra.mxu0 %v2517_v20  ;;  %1552 = vmatpush1.bf16.msra.mxu1 %v2520_v21  ;;  %v2613_v20 = vld [vmem:[#allocation7 + $0x40] sm:$0xff]  }
  0xc2   :  { %1389 = vmatprep.subr.bf16.mxu0 %v2525_v22  ;;  %1553 = vmatprep.subr.bf16.mxu1 %v2528_v23  ;;  %v2614_v21 = vld [vmem:[#allocation7 + $0xc0] sm:$0xff]   ;;  %v2746_v22 = vmov 0   ;;  %v67_v23 = vld [vmem:[#allocation2 + $0x30] sm:$0xff] }
  0xc5   :  { %1390 = vmatpush1.bf16.msra.mxu0 %v2523_v24  ;;  %1554 = vmatpush1.bf16.msra.mxu1 %v2526_v25  ;;  %v74_v24 = vpack.c.bf16 %v67_v23, %v67_v23  ;;  %v2615_v25 = vld [vmem:[#allocation7] sm:$0xff]  }
  0xc6   :  { %1391 = vmatprep.subr.bf16.mxu0 %v2531_v26  ;;  %1555 = vmatprep.subr.bf16.mxu1 %v2534_v27  ;;  %v2616_v26 = vld [vmem:[#allocation7 + $0x80] sm:$0xff]   ;;  %v2617_v27 = vld [vmem:[#allocation7 + $0x48] sm:$0xff]  }
  0xc9   :  { %1392 = vmatpush1.bf16.msra.mxu0 %v2529_v28  ;;  %1556 = vmatpush1.bf16.msra.mxu1 %v2532_v29  ;;  %v2618_v28 = vld [vmem:[#allocation7 + $0xc8] sm:$0xff]  }
  0xca   :  { %1393 = vmatprep.subr.bf16.mxu0 %v2537_v30  ;;  %1557 = vmatprep.subr.bf16.mxu1 %v2540_v31  ;;  %v2619_v29 = vld [vmem:[#allocation7 + $0x8] sm:$0xff]   ;;  %v2621_v31 = vld [vmem:[#allocation7 + $0x50] sm:$0xff]  }
  0xcb   :  { %v2620_v30 = vld [vmem:[#allocation7 + $0x88] sm:$0xff]  }
  0xcd   :  { %1394 = vmatpush1.bf16.msra.mxu0 %v2535_v32  ;;  %1558 = vmatpush1.bf16.msra.mxu1 %v2538_v33  ;;  %v2622_v32 = vld [vmem:[#allocation7 + $0xd0] sm:$0xff]  }
  0xce   :  { %1395 = vmatprep.subr.bf16.mxu0 %v2543_v34  ;;  %1559 = vmatprep.subr.bf16.mxu1 %v2546_v35  ;;  %v2623_v33 = vld [vmem:[#allocation7 + $0x10] sm:$0xff]   ;;  %v2625_v35 = vld [vmem:[#allocation7 + $0x58] sm:$0xff]  }
  0xcf   :  { %v2624_v34 = vld [vmem:[#allocation7 + $0x90] sm:$0xff]  }
  0xd1   :  { %1396 = vmatpush1.bf16.msra.mxu0 %v2541_v36  ;;  %1560 = vmatpush1.bf16.msra.mxu1 %v2544_v37  ;;  %v2626_v36 = vld [vmem:[#allocation7 + $0xd8] sm:$0xff]  }
  0xd2   :  { %1397 = vmatprep.subr.bf16.mxu0 %v2549_v38  ;;  %1561 = vmatprep.subr.bf16.mxu1 %v2552_v39  ;;  %v2627_v37 = vld [vmem:[#allocation7 + $0x18] sm:$0xff]   ;;  %v2629_v39 = vld [vmem:[#allocation7 + $0x60] sm:$0xff]  }
  0xd3   :  { %v2628_v38 = vld [vmem:[#allocation7 + $0x98] sm:$0xff]  }
  0xd5   :  { %1398 = vmatpush1.bf16.msra.mxu0 %v2547_v40  ;;  %1562 = vmatpush1.bf16.msra.mxu1 %v2550_v41  ;;  %v2630_v40 = vld [vmem:[#allocation7 + $0xe0] sm:$0xff]  }
  0xd6   :  { %1399 = vmatprep.subr.bf16.mxu0 %v2555_v42  ;;  %1563 = vmatprep.subr.bf16.mxu1 %v2558_v43  ;;  %v2631_v41 = vld [vmem:[#allocation7 + $0x20] sm:$0xff]   ;;  %v2633_v43 = vld [vmem:[#allocation7 + $0x68] sm:$0xff]  }
  0xd7   :  { %v2632_v42 = vld [vmem:[#allocation7 + $0xa0] sm:$0xff]  }
  0xd9   :  { %1400 = vmatpush1.bf16.msra.mxu0 %v2553_v44  ;;  %1564 = vmatpush1.bf16.msra.mxu1 %v2556_v45  ;;  %v2634_v44 = vld [vmem:[#allocation7 + $0xe8] sm:$0xff]  }
  0xda   :  { %1401 = vmatprep.subr.bf16.mxu0 %v2561_v46  ;;  %1565 = vmatprep.subr.bf16.mxu1 %v2564_v47  ;;  %v2635_v45 = vld [vmem:[#allocation7 + $0x28] sm:$0xff]   ;;  %v2637_v47 = vld [vmem:[#allocation7 + $0x70] sm:$0xff]  }
  0xdb   :  { %v2636_v46 = vld [vmem:[#allocation7 + $0xa8] sm:$0xff]  }
  0xdd   :  { %1402 = vmatpush1.bf16.msra.mxu0 %v2559_v48  ;;  %1566 = vmatpush1.bf16.msra.mxu1 %v2562_v49  ;;  %v2638_v48 = vld [vmem:[#allocation7 + $0xf0] sm:$0xff]  }
  0xde   :  { %1403 = vmatprep.subr.bf16.mxu0 %v2567_v50  ;;  %1567 = vmatprep.subr.bf16.mxu1 %v2570_v51  ;;  %v2639_v49 = vld [vmem:[#allocation7 + $0x30] sm:$0xff]   ;;  %v2641_v51 = vld [vmem:[#allocation7 + $0x78] sm:$0xff]  }
  0xdf   :  { %v2640_v50 = vld [vmem:[#allocation7 + $0xb0] sm:$0xff]  }
  0xe1   :  { %1404 = vmatpush1.bf16.msra.mxu0 %v2565_v52  ;;  %1568 = vmatpush1.bf16.msra.mxu1 %v2568_v53  ;;  %v2642_v52 = vld [vmem:[#allocation7 + $0xf8] sm:$0xff]  }
  0xe2   :  { %1405 = vmatprep.subr.bf16.mxu0 %v2573_v54  ;;  %1569 = vmatprep.subr.bf16.mxu1 %v2576_v55  ;;  %v2643_v53 = vld [vmem:[#allocation7 + $0x38] sm:$0xff]   ;;  %v277_v55 = vlaneseq }
  0xe3   :  { %v2644_v54 = vld [vmem:[#allocation7 + $0xb8] sm:$0xff]  }
  0xe5   :  { %1406 = vmatpush1.bf16.msra.mxu0 %v2571_v56  ;;  %1570 = vmatpush1.bf16.msra.mxu1 %v2574_v57  ;;  %v278_v56 = vshrl.u32 %v277_v55, 7 }
  0xe6   :  { %1407 = vmatprep.subr.bf16.mxu0 %v2579_v58  ;;  %1571 = vmatprep.subr.bf16.mxu1 %v2582_v59  ;;  %v275_v59 = vld [vmem:[%s2834_s2] sm:$0xf] }
  0xe7   :  { %v279_v57 = vsub.s32 0, %v278_v56  ;;  %v287_v58 = vsub.s32 2, %v278_v56 }
  0xe9   :  { %1408 = vmatpush1.bf16.msra.mxu0 %v2577_v60  ;;  %1572 = vmatpush1.bf16.msra.mxu1 %v2580_v61  ;;  %v283_v60 = vsub.s32 1, %v278_v56  ;;  %v291_v61 = vsub.s32 3, %v278_v56 }
  0xea   :  { %1409 = vmatprep.subr.bf16.mxu0 %v2585_v62  ;;  %1573 = vmatprep.subr.bf16.mxu1 %v2588_v63  ;;  %v280_v62 = vrot.slane %v275_v59, %v279_v57  ;;  %v288_v63 = vrot.slane %v275_v59, %v287_v58 }
  0xed   :  { %1410 = vmatpush1.bf16.msra.mxu0 %v2583_v0  ;;  %1574 = vmatpush1.bf16.msra.mxu1 %v2586_v1  ;;  %v284_v0 = vrot.slane %v275_v59, %v283_v60  ;;  %v292_v1 = vrot.slane %v275_v59, %v291_v61 }
  0xee   :  { %1411 = vmatprep.subr.bf16.mxu0 %v2591_v2  ;;  %1575 = vmatprep.subr.bf16.mxu1 %v2594_v3 }
  0xf1   :  { %1412 = vmatpush1.bf16.msra.mxu0 %v2589_v4  ;;  %1576 = vmatpush1.bf16.msra.mxu1 %v2592_v5 }
  0xf2   :  { %1413 = vmatprep.subr.bf16.mxu0 %v2597_v6  ;;  %1577 = vmatprep.subr.bf16.mxu1 %v2600_v7 }
  0xf5   :  { %1414 = vmatpush1.bf16.msra.mxu0 %v2595_v8  ;;  %1578 = vmatpush1.bf16.msra.mxu1 %v2598_v9 }
  0xf6   :  { %1424 = vmatprep.subr.bf16.mxu0 %v2603_v11  ;;  %1588 = vmatprep.subr.bf16.mxu1 %v2606_v12 }
  0xf8   :  { %1416 = vmatmul.mubr.bf16.vlgmr.msra.gmra.mrb[0].mxu0 %v72_v13  ;;  %1580 = vmatmul.mubr.bf16.vlgmr.msra.gmra.mrb[0].mxu1 %v72_v13 }
  0xf9   :  { %1425 = vmatpush1.bf16.msra.mxu0 %v2601_v14  ;;  %1589 = vmatpush1.bf16.msra.mxu1 %v2604_v15 }
  0xfa   :  { %1426 = vmatprep.subr.bf16.mxu0 %v2609_v16  ;;  %1590 = vmatprep.subr.bf16.mxu1 %v2612_v17 }
  0xfb   :  { %1456 = vmatprep.mubr.bf16.mxu0 %v2746_v22  ;;  %1620 = vmatprep.mubr.bf16.mxu1 %v2746_v22 }
  0xfd   :  { %1427 = vmatpush1.bf16.msra.mxu0 %v2607_v18  ;;  %1591 = vmatpush1.bf16.msra.mxu1 %v2610_v19 }
  0xfe   :  { %2232 = vmatprep.subr.bf16.mxu0 %v2613_v20  ;;  %2254 = vmatprep.subr.bf16.mxu1 %v2614_v21 }
 0x104   :  { %2197 = vmatmul.mubr.msk.bf16.vlgmr.msra.gmra.mrb[0].mxu0 %vm1297_vm0, %v74_v24  ;;  %2198 = vmatmul.mubr.msk.bf16.vlgmr.msra.gmra.mrb[0].mxu1 %vm1297_vm0, %v74_v24  ;;  %v2199_v24 = vld [vmem:[%s2836_s4] ss:$0 sm:$0xff] }
 0x105   :  { %2233 = vmatpush3.bf16.msra.mxu0 %v2615_v25  ;;  %2255 = vmatpush3.bf16.msra.mxu1 %v2616_v26 }
 0x106   :  { %2234 = vmatprep.subr.bf16.mxu0 %v2617_v27  ;;  %2256 = vmatprep.subr.bf16.mxu1 %v2618_v28 }
 0x109   :  { %2235 = vmatpush3.bf16.msra.mxu0 %v2619_v29  ;;  %2257 = vmatpush3.bf16.msra.mxu1 %v2620_v30 }
 0x10a   :  { %2236 = vmatprep.subr.bf16.mxu0 %v2621_v31  ;;  %2258 = vmatprep.subr.bf16.mxu1 %v2622_v32 }
 0x10d   :  { %2237 = vmatpush3.bf16.msra.mxu0 %v2623_v33  ;;  %2259 = vmatpush3.bf16.msra.mxu1 %v2624_v34 }
 0x10e   :  { %2238 = vmatprep.subr.bf16.mxu0 %v2625_v35  ;;  %2260 = vmatprep.subr.bf16.mxu1 %v2626_v36 }
 0x111   :  { %2239 = vmatpush3.bf16.msra.mxu0 %v2627_v37  ;;  %2261 = vmatpush3.bf16.msra.mxu1 %v2628_v38 }
 0x112   :  { %2240 = vmatprep.subr.bf16.mxu0 %v2629_v39  ;;  %2262 = vmatprep.subr.bf16.mxu1 %v2630_v40 }
 0x115   :  { %2241 = vmatpush3.bf16.msra.mxu0 %v2631_v41  ;;  %2263 = vmatpush3.bf16.msra.mxu1 %v2632_v42 }
 0x116   :  { %2242 = vmatprep.subr.bf16.mxu0 %v2633_v43  ;;  %2264 = vmatprep.subr.bf16.mxu1 %v2634_v44 }
 0x119   :  { %2243 = vmatpush3.bf16.msra.mxu0 %v2635_v45  ;;  %2265 = vmatpush3.bf16.msra.mxu1 %v2636_v46 }
 0x11a   :  { %2244 = vmatprep.subr.bf16.mxu0 %v2637_v47  ;;  %2266 = vmatprep.subr.bf16.mxu1 %v2638_v48 }
 0x11d   :  { %2245 = vmatpush3.bf16.msra.mxu0 %v2639_v49  ;;  %2267 = vmatpush3.bf16.msra.mxu1 %v2640_v50 }
 0x11e   :  { %2246 = vmatprep.subr.bf16.mxu0 %v2641_v51  ;;  %2268 = vmatprep.subr.bf16.mxu1 %v2642_v52 }
 0x121   :  { %2247 = vmatpush3.bf16.msra.mxu0 %v2643_v53  ;;  %2269 = vmatpush3.bf16.msra.mxu1 %v2644_v54 }
 0x1d7   :  { %v1458_v2 = vpop.f32.mrb[0].mxu0  ;;  %v1622_v3 = vpop.f32.mrb[0].mxu1 }
 0x1d8   :  { %v2276_v4 = vadd.f32 %v1458_v2, %v280_v62  ;;  %v2278_v5 = vadd.f32 %v1622_v3, %v288_v63  ;;  %v1460_v6 = vpop.f32.mrb[1].mxu0  ;;  %v1624_v7 = vpop.f32.mrb[1].mxu1 }
 0x1d9   :  { %v2277_v8 = vadd.f32 %v1460_v6, %v284_v0  ;;  %v2279_v9 = vadd.f32 %v1624_v7, %v292_v1  ;;  %v1462_v10 = vpop.f32.mrb[2].mxu0  ;;  %v1626_v11 = vpop.f32.mrb[2].mxu1 }
 0x1da   :  { %v1629_v12 = vmax.f32 %v2276_v4, 0.0  ;;  %v1631_v13 = vmax.f32 %v2278_v5, 0.0  ;;  %v1463_v14 = vpop.f32.mrb[3].mxu0  ;;  %v1627_v15 = vpop.f32.mrb[3].mxu1 }
 0x1db   :  { %v1630_v16 = vmax.f32 %v2277_v8, 0.0  ;;  %v1632_v17 = vmax.f32 %v2279_v9, 0.0 }
 0x1dc   :  { %v1633_v20 = vpack.c.bf16 %v1629_v12, %v1629_v12  ;;  %v1635_v21 = vpack.c.bf16 %v1631_v13, %v1631_v13 }
 0x1dd   :  { %v1634_v18 = vpack.c.bf16 %v1630_v16, %v1630_v16  ;;  %v1636_v19 = vpack.c.bf16 %v1632_v17, %v1632_v17 }
 0x1df   :  { %1932 = vmatprep.mubr.bf16.mxu0 %v1634_v18  ;;  %1972 = vmatprep.mubr.bf16.mxu1 %v1636_v19 }
 0x1e0   :  { %1933 = vmatmul.mubr.bf16.vlgmr.msra.gmra.mrb[4].mxu0 %v1633_v20  ;;  %1973 = vmatmul.mubr.bf16.vlgmr.msra.gmra.mrb[4].mxu1 %v1635_v21 }
 0x2b3   :  { %v2248_v22 = vpop.f32.mrb[4].mxu0  ;;  %v2270_v23 = vpop.f32.mrb[4].mxu1 }
 0x2b4   :  { %v2249_v25 = vpop.f32.mrb[5].mxu0  ;;  %v2271_v26 = vpop.f32.mrb[5].mxu1 }
 0x2b5   :  { %v2250_v27 = vadd.f32 %v2249_v25, %v2248_v22  ;;  %v2272_v28 = vadd.f32 %v2271_v26, %v2270_v23  ;;  %v2251_v29 = vpop.f32.mrb[6].mxu0  ;;  %v2273_v30 = vpop.f32.mrb[6].mxu1 }
 0x2b6   :  { %v2252_v31 = vpop.f32.mrb[7].mxu0  ;;  %v2274_v32 = vpop.f32.mrb[7].mxu1 }
 0x2b7   :  { %v1935_v33 = vadd.f32 %v2250_v27, %v2199_v24 }
 0x2b9   :  { %v1975_v34 = vadd.f32 %v2272_v28, %v1935_v33 }
 0x2bb   :  { %1980 = vst [vmem:[#allocation8] sm:$0xff] %v1975_v34 }
 0x2bc   :  { %2722 = shalt.err (!%p2719_p0)
}
 0x2bd   :  { %s2723_s12 = scalar_lea.hbm %s2837_s5, 128 }
 0x2be   :  { %p2724_p1 = scmp.ne.s32.totalorder %s2837_s5, %s2723_s12  ;;  %p2727_p2 = scmp.lt.u32.totalorder %s2723_s12, %s2837_s5 }
 0x2c0   :  { %p2729_p3 = pnand %p2727_p2, %p2724_p1 }
 0x2c2   :  { %2732 = shalt.err (!%p2729_p3)
}
 0x2c3   :  { %1990 = dma.vmem_to_hbm [thread:$0]  %s1988_s9, 128, %s2837_s5, [#allocation4]  }
 0x2c4   :  { %2737 = dma.done.wait [#allocation4], 128  }
 0x2c5   :  { %2738 = vsyncadd [#allocation4], 4294967168 }
 0x2c6   :  { %1994 = vsyncpa [#allocation3], 1 }
 0x2c7   :  { %1995 = vsyncpa [#allocation6], 1 }
 0x2c8   :  { %1996 = vsyncpa [#allocation4], 1 }

// kernel: _predictor_forward_impl.1
= control target key start
LH: loop header
LB: loop body
LE: loop exit
PB: predicated region body
PF: predicated region fallthrough
CT: control target
= control target key end

     0   :  { %10 = vsyncpa [#allocation3], 0  ;;  %s2832_s0 = inlined_call_operand.hbm [shape: f32[8,800], index: 0, kind: input, shape index: {}]   ;;  %s2833_s1 = inlined_call_operand.hbm [shape: bf16[800,512], index: 1, kind: input, shape index: {}]   ;;  %s2834_s2 = inlined_call_operand.vmem [shape: f32[1,512], index: 2, kind: input, shape index: {}]   ;;  %s2835_s3 = inlined_call_operand.hbm [shape: bf16[512,128], index: 3, kind: input, shape index: {}]   ;;  %s2836_s4 = inlined_call_operand.vmem [shape: f32[1,128], index: 4, kind: input, shape index: {}]   ;;  %s2837_s5 = inlined_call_operand.hbm [shape: f32[8,128], index: 5, kind: output, shape index: {}]  }
   0x1   :  { %11 = vsyncpa [#allocation6], 0 }
   0x2   :  { %12 = vsyncpa [#allocation4], 0  ;;  %s2739_s18 = smov [#allocation5]   ;;  %s2645_s22 = scalar_lea.hbm %s2833_s1, 25600 }
   0x3   :  { %s28_s19 = sshll.u32 %s2739_s18, 4  ;;  %p2646_p0 = scmp.ne.s32.totalorder %s2833_s1, %s2645_s22  ;;  %s29_s19 = int_to_ptr.vmem [resolvable:$true] %s28_s19 }
   0x4   :  { %p2649_p1 = scmp.lt.u32.totalorder %s2645_s22, %s2833_s1 }
   0x6   :  { %p2651_p2 = pnand %p2649_p1, %p2646_p0 }
   0x8   :  { %2654 = shalt.err (!%p2651_p2)
}
   0x9   :  { %s2655_s27 = scalar_lea.vmem %s29_s19, 25600  ;;  %p2660_p4 = scmp.lt.s32.totalorder %s29_s19, %s29_s19 }
   0xa   :  { %p2656_p3 = scmp.ne.s32.totalorder %s29_s19, %s2655_s27  ;;  %p2661_p5 = scmp.lt.s32.totalorder %s2655_s27, %s2655_s27 }
   0xc   :  { %p2662_p6 = por %p2661_p5, %p2660_p4 }
   0xe   :  { %p2663_p7 = pnand %p2662_p6, %p2656_p3 }
  0x10   :  { %2666 = shalt.err (!%p2663_p7)
}
  0x11   :  { %s2740_s28 = smov 256   ;;  %s2741_s29 = smov 16  }
  0x12   :  { %34 = dma.hbm_to_vmem [thread:$0]  %s2833_s1, 25600, %s29_s19, [#allocation6], %s2740_s28, %s2740_s28, %s2741_s29  }
  0x13   :  { %s2742_s7 = smov [#allocation2]   ;;  %s2743_s9 = smov [#allocation7]  }
  0x14   :  { %s19_s8 = sshll.u32 %s2742_s7, 4  ;;  %s42_s10 = sshll.u32 %s2743_s9, 4  ;;  %s20_s8 = int_to_ptr.vmem [resolvable:$true] %s19_s8  ;;  %s43_s10 = int_to_ptr.vmem [resolvable:$true] %s42_s10 }
  0x15   :  { %s2667_s13 = scalar_lea.hbm %s2832_s0, 896 }
  0x16   :  { %p2668_p8 = scmp.ne.s32.totalorder %s2832_s0, %s2667_s13  ;;  %p2671_p9 = scmp.lt.u32.totalorder %s2667_s13, %s2832_s0 }
  0x18   :  { %p2673_p10 = pnand %p2671_p9, %p2668_p8 }
  0x1a   :  { %2676 = shalt.err (!%p2673_p10)
}
  0x1b   :  { %s2677_s1 = scalar_lea.vmem %s20_s8, 896  ;;  %p2682_p12 = scmp.lt.s32.totalorder %s20_s8, %s20_s8 }
  0x1c   :  { %p2678_p11 = scmp.ne.s32.totalorder %s20_s8, %s2677_s1  ;;  %p2683_p13 = scmp.lt.s32.totalorder %s2677_s1, %s2677_s1 }
  0x1e   :  { %p2684_p0 = por %p2683_p13, %p2682_p12 }
  0x20   :  { %p2685_p1 = pnand %p2684_p0, %p2678_p11 }
  0x22   :  { %2688 = shalt.err (!%p2685_p1)
}
  0x23   :  { %22 = dma.hbm_to_vmem [thread:$0]  %s2832_s0, 896, %s20_s8, [#allocation3]  }
  0x24   :  { %s2689_s22 = scalar_lea.hbm %s2835_s3, 4096 }
  0x25   :  { %p2690_p2 = scmp.ne.s32.totalorder %s2835_s3, %s2689_s22  ;;  %p2693_p3 = scmp.lt.u32.totalorder %s2689_s22, %s2835_s3 }
  0x27   :  { %p2695_p4 = pnand %p2693_p3, %p2690_p2 }
  0x29   :  { %2698 = shalt.err (!%p2695_p4)
}
  0x2a   :  { %s2699_s27 = scalar_lea.vmem %s43_s10, 4096  ;;  %p2704_p6 = scmp.lt.s32.totalorder %s43_s10, %s43_s10 }
  0x2b   :  { %p2700_p5 = scmp.ne.s32.totalorder %s43_s10, %s2699_s27  ;;  %p2705_p7 = scmp.lt.s32.totalorder %s2699_s27, %s2699_s27 }
  0x2d   :  { %p2706_p8 = por %p2705_p7, %p2704_p6 }
  0x2f   :  { %p2707_p9 = pnand %p2706_p8, %p2700_p5 }
  0x31   :  { %2710 = shalt.err (!%p2707_p9)
}
  0x32   :  { %s2744_s0 = smov 64   ;;  %s2745_s28 = smov 4  }
  0x33   :  { %48 = dma.hbm_to_vmem [thread:$0]  %s2835_s3, 4096, %s43_s10, [#allocation6], %s2744_s0, %s2744_s0, %s2745_s28  }
  0x34   :  { %2733 = dma.done.wait [#allocation3], 896  }
  0x35   :  { %2734 = vsyncadd [#allocation3], 4294966400 }
  0x36   :  { %2735 = dma.done.wait [#allocation6], 29696  }
  0x37   :  { %2736 = vsyncadd [#allocation6], 4294937600  ;;  %v2313_v0 = vld [vmem:[#allocation5 + $0x4] ss:$16 sps:$4 sm:$0xff]   ;;  %v2315_v1 = vld [vmem:[#allocation5 + $0xc] ss:$16 sps:$4 sm:$0xff]  }
  0x38   :  { %1301 = vmatprep.subr.bf16.mxu0 %v2313_v0  ;;  %v2317_v2 = vld [vmem:[#allocation5] ss:$16 sps:$4 sm:$0xff]   ;;  %v2318_v3 = vld [vmem:[#allocation5 + $0x8] ss:$16 sps:$4 sm:$0xff]   ;;  %1465 = vmatprep.subr.bf16.mxu1 %v2315_v1  ;;  %v2319_v4 = vld [vmem:[#allocation5 + $0x24] ss:$16 sps:$4 sm:$0xff]  }
  0x39   :  { %1302 = vmatpush1.bf16.msra.mxu0 %v2317_v2  ;;  %1466 = vmatpush1.bf16.msra.mxu1 %v2318_v3  ;;  %v2321_v5 = vld [vmem:[#allocation5 + $0x2c] ss:$16 sps:$4 sm:$0xff]   ;;  %v2323_v6 = vld [vmem:[#allocation5 + $0x20] ss:$16 sps:$4 sm:$0xff]   ;;  %v2324_v7 = vld [vmem:[#allocation5 + $0x28] ss:$16 sps:$4 sm:$0xff]  }
  0x3a   :  { %1303 = vmatprep.subr.bf16.mxu0 %v2319_v4  ;;  %1467 = vmatprep.subr.bf16.mxu1 %v2321_v5  ;;  %v2325_v8 = vld [vmem:[#allocation5 + $0x44] ss:$16 sps:$4 sm:$0xff]   ;;  %v2327_v9 = vld [vmem:[#allocation5 + $0x4c] ss:$16 sps:$4 sm:$0xff]   ;;  %v2329_v10 = vld [vmem:[#allocation5 + $0x40] ss:$16 sps:$4 sm:$0xff]  }
  0x3b   :  { %v2330_v11 = vld [vmem:[#allocation5 + $0x48] ss:$16 sps:$4 sm:$0xff]   ;;  %v2331_v12 = vld [vmem:[#allocation5 + $0x64] ss:$16 sps:$4 sm:$0xff]   ;;  %v2333_v13 = vld [vmem:[#allocation5 + $0x6c] ss:$16 sps:$4 sm:$0xff]  }
  0x3c   :  { %v2335_v14 = vld [vmem:[#allocation5 + $0x60] ss:$16 sps:$4 sm:$0xff]   ;;  %v2336_v15 = vld [vmem:[#allocation5 + $0x68] ss:$16 sps:$4 sm:$0xff]   ;;  %v2337_v16 = vld [vmem:[#allocation5 + $0x84] ss:$16 sps:$4 sm:$0xff]  }
  0x3d   :  { %1304 = vmatpush1.bf16.msra.mxu0 %v2323_v6  ;;  %1468 = vmatpush1.bf16.msra.mxu1 %v2324_v7  ;;  %v2339_v17 = vld [vmem:[#allocation5 + $0x8c] ss:$16 sps:$4 sm:$0xff]   ;;  %v2341_v18 = vld [vmem:[#allocation5 + $0x80] ss:$16 sps:$4 sm:$0xff]   ;;  %v2342_v19 = vld [vmem:[#allocation5 + $0x88] ss:$16 sps:$4 sm:$0xff]  }
  0x3e   :  { %1305 = vmatprep.subr.bf16.mxu0 %v2325_v8  ;;  %1469 = vmatprep.subr.bf16.mxu1 %v2327_v9  ;;  %v2343_v20 = vld [vmem:[#allocation5 + $0xa4] ss:$16 sps:$4 sm:$0xff]   ;;  %v2345_v21 = vld [vmem:[#allocation5 + $0xac] ss:$16 sps:$4 sm:$0xff]   ;;  %v2347_v22 = vld [vmem:[#allocation5 + $0xa0] ss:$16 sps:$4 sm:$0xff]  }
  0x3f   :  { %v2348_v23 = vld [vmem:[#allocation5 + $0xa8] ss:$16 sps:$4 sm:$0xff]   ;;  %v2349_v24 = vld [vmem:[#allocation5 + $0xc4] ss:$16 sps:$4 sm:$0xff]   ;;  %v2351_v25 = vld [vmem:[#allocation5 + $0xcc] ss:$16 sps:$4 sm:$0xff]  }
  0x40   :  { %v2353_v26 = vld [vmem:[#allocation5 + $0xc0] ss:$16 sps:$4 sm:$0xff]   ;;  %v2354_v27 = vld [vmem:[#allocation5 + $0xc8] ss:$16 sps:$4 sm:$0xff]   ;;  %v2355_v28 = vld [vmem:[#allocation5 + $0xe4] ss:$16 sps:$4 sm:$0xff]  }
  0x41   :  { %1306 = vmatpush1.bf16.msra.mxu0 %v2329_v10  ;;  %1470 = vmatpush1.bf16.msra.mxu1 %v2330_v11  ;;  %v2357_v29 = vld [vmem:[#allocation5 + $0xec] ss:$16 sps:$4 sm:$0xff]   ;;  %v2359_v30 = vld [vmem:[#allocation5 + $0xe0] ss:$16 sps:$4 sm:$0xff]   ;;  %v2360_v31 = vld [vmem:[#allocation5 + $0xe8] ss:$16 sps:$4 sm:$0xff]  }
  0x42   :  { %1307 = vmatprep.subr.bf16.mxu0 %v2331_v12  ;;  %1471 = vmatprep.subr.bf16.mxu1 %v2333_v13  ;;  %v2361_v32 = vld [vmem:[#allocation5 + $0x104] ss:$16 sps:$4 sm:$0xff]   ;;  %v2363_v33 = vld [vmem:[#allocation5 + $0x10c] ss:$16 sps:$4 sm:$0xff]   ;;  %v2365_v34 = vld [vmem:[#allocation5 + $0x100] ss:$16 sps:$4 sm:$0xff]  }
  0x43   :  { %v2366_v35 = vld [vmem:[#allocation5 + $0x108] ss:$16 sps:$4 sm:$0xff]   ;;  %v2367_v36 = vld [vmem:[#allocation5 + $0x124] ss:$16 sps:$4 sm:$0xff]   ;;  %v2369_v37 = vld [vmem:[#allocation5 + $0x12c] ss:$16 sps:$4 sm:$0xff]  }
  0x44   :  { %v2371_v38 = vld [vmem:[#allocation5 + $0x120] ss:$16 sps:$4 sm:$0xff]   ;;  %v2372_v39 = vld [vmem:[#allocation5 + $0x128] ss:$16 sps:$4 sm:$0xff]   ;;  %v2373_v40 = vld [vmem:[#allocation5 + $0x144] ss:$16 sps:$4 sm:$0xff]  }
  0x45   :  { %1308 = vmatpush1.bf16.msra.mxu0 %v2335_v14  ;;  %1472 = vmatpush1.bf16.msra.mxu1 %v2336_v15  ;;  %v2375_v41 = vld [vmem:[#allocation5 + $0x14c] ss:$16 sps:$4 sm:$0xff]   ;;  %v2377_v42 = vld [vmem:[#allocation5 + $0x140] ss:$16 sps:$4 sm:$0xff]   ;;  %v2378_v43 = vld [vmem:[#allocation5 + $0x148] ss:$16 sps:$4 sm:$0xff]  }
  0x46   :  { %1309 = vmatprep.subr.bf16.mxu0 %v2337_v16  ;;  %1473 = vmatprep.subr.bf16.mxu1 %v2339_v17  ;;  %v2379_v44 = vld [vmem:[#allocation5 + $0x164] ss:$16 sps:$4 sm:$0xff]   ;;  %v2381_v45 = vld [vmem:[#allocation5 + $0x16c] ss:$16 sps:$4 sm:$0xff]   ;;  %v2383_v47 = vld [vmem:[#allocation5 + $0x160] ss:$16 sps:$4 sm:$0xff]  }
  0x47   :  { %v62_v46 = vld [vmem:[#allocation2 + $0x8] sm:$0xff]  ;;  %v2384_v49 = vld [vmem:[#allocation5 + $0x168] ss:$16 sps:$4 sm:$0xff]   ;;  %v2387_v51 = vld [vmem:[#allocation5 + $0x18c] ss:$16 sps:$4 sm:$0xff]   ;;  %vm1297_vm0 = vcmask 261120  }
  0x48   :  { %v69_v48 = vpack.c.bf16 %v62_v46, %v62_v46  ;;  %v2385_v50 = vld [vmem:[#allocation5 + $0x184] ss:$16 sps:$4 sm:$0xff]   ;;  %v2389_v52 = vld [vmem:[#allocation5 + $0x180] ss:$16 sps:$4 sm:$0xff]   ;;  %v2390_v53 = vld [vmem:[#allocation5 + $0x188] ss:$16 sps:$4 sm:$0xff]  }
  0x49   :  { %1310 = vmatpush1.bf16.msra.mxu0 %v2341_v18  ;;  %1474 = vmatpush1.bf16.msra.mxu1 %v2342_v19  ;;  %v2391_v54 = vld [vmem:[#allocation5 + $0x1a4] ss:$16 sps:$4 sm:$0xff]   ;;  %v2393_v55 = vld [vmem:[#allocation5 + $0x1ac] ss:$16 sps:$4 sm:$0xff]   ;;  %v2395_v56 = vld [vmem:[#allocation5 + $0x1a0] ss:$16 sps:$4 sm:$0xff]  }
  0x4a   :  { %1311 = vmatprep.subr.bf16.mxu0 %v2343_v20  ;;  %1475 = vmatprep.subr.bf16.mxu1 %v2345_v21  ;;  %v2396_v57 = vld [vmem:[#allocation5 + $0x1a8] ss:$16 sps:$4 sm:$0xff]   ;;  %v2397_v58 = vld [vmem:[#allocation5 + $0x1c4] ss:$16 sps:$4 sm:$0xff]   ;;  %v2399_v59 = vld [vmem:[#allocation5 + $0x1cc] ss:$16 sps:$4 sm:$0xff]  }
  0x4b   :  { %1333 = vmatprep.mubr.bf16.mxu0 %v69_v48  ;;  %1497 = vmatprep.mubr.bf16.mxu1 %v69_v48  ;;  %v2401_v60 = vld [vmem:[#allocation5 + $0x1c0] ss:$16 sps:$4 sm:$0xff]   ;;  %v2402_v61 = vld [vmem:[#allocation5 + $0x1c8] ss:$16 sps:$4 sm:$0xff]   ;;  %v2403_v62 = vld [vmem:[#allocation5 + $0x1e4] ss:$16 sps:$4 sm:$0xff]  }
  0x4c   :  { %v2405_v63 = vld [vmem:[#allocation5 + $0x1ec] ss:$16 sps:$4 sm:$0xff]   ;;  %v2407_v0 = vld [vmem:[#allocation5 + $0x1e0] ss:$16 sps:$4 sm:$0xff]   ;;  %v2408_v1 = vld [vmem:[#allocation5 + $0x1e8] ss:$16 sps:$4 sm:$0xff]  }
  0x4d   :  { %1312 = vmatpush1.bf16.msra.mxu0 %v2347_v22  ;;  %1476 = vmatpush1.bf16.msra.mxu1 %v2348_v23  ;;  %v61_v2 = vld [vmem:[#allocation2] sm:$0xff]  ;;  %v2411_v3 = vld [vmem:[#allocation5 + $0x204] ss:$16 sps:$4 sm:$0xff]   ;;  %v2409_v6 = vld [vmem:[#allocation5 + $0x200] ss:$16 sps:$4 sm:$0xff]   ;;  %s2747_s8 = smov [#allocation8]  }
  0x4e   :  { %1313 = vmatprep.subr.bf16.mxu0 %v2349_v24  ;;  %1477 = vmatprep.subr.bf16.mxu1 %v2351_v25  ;;  %v2414_v4 = vld [vmem:[#allocation5 + $0x20c] ss:$16 sps:$4 sm:$0xff]   ;;  %v68_v5 = vpack.c.bf16 %v61_v2, %v61_v2  ;;  %v2412_v7 = vld [vmem:[#allocation5 + $0x208] ss:$16 sps:$4 sm:$0xff]   ;;  %v2417_v8 = vld [vmem:[#allocation5 + $0x224] ss:$16 sps:$4 sm:$0xff]  }
  0x4f   :  { %v2420_v9 = vld [vmem:[#allocation5 + $0x22c] ss:$16 sps:$4 sm:$0xff]   ;;  %v2415_v10 = vld [vmem:[#allocation5 + $0x220] ss:$16 sps:$4 sm:$0xff]   ;;  %v2418_v11 = vld [vmem:[#allocation5 + $0x228] ss:$16 sps:$4 sm:$0xff]  }
  0x50   :  { %v2423_v12 = vld [vmem:[#allocation5 + $0x244] ss:$16 sps:$4 sm:$0xff]   ;;  %v2426_v13 = vld [vmem:[#allocation5 + $0x24c] ss:$16 sps:$4 sm:$0xff]   ;;  %v2421_v14 = vld [vmem:[#allocation5 + $0x240] ss:$16 sps:$4 sm:$0xff]  }
  0x51   :  { %1314 = vmatpush1.bf16.msra.mxu0 %v2353_v26  ;;  %1478 = vmatpush1.bf16.msra.mxu1 %v2354_v27  ;;  %v2424_v15 = vld [vmem:[#allocation5 + $0x248] ss:$16 sps:$4 sm:$0xff]   ;;  %v2429_v16 = vld [vmem:[#allocation5 + $0x264] ss:$16 sps:$4 sm:$0xff]   ;;  %v2432_v17 = vld [vmem:[#allocation5 + $0x26c] ss:$16 sps:$4 sm:$0xff]  }
  0x52   :  { %1315 = vmatprep.subr.bf16.mxu0 %v2355_v28  ;;  %1479 = vmatprep.subr.bf16.mxu1 %v2357_v29  ;;  %v2427_v18 = vld [vmem:[#allocation5 + $0x260] ss:$16 sps:$4 sm:$0xff]   ;;  %v2430_v19 = vld [vmem:[#allocation5 + $0x268] ss:$16 sps:$4 sm:$0xff]   ;;  %v2435_v20 = vld [vmem:[#allocation5 + $0x284] ss:$16 sps:$4 sm:$0xff]  }
  0x53   :  { %v2438_v21 = vld [vmem:[#allocation5 + $0x28c] ss:$16 sps:$4 sm:$0xff]   ;;  %v2433_v22 = vld [vmem:[#allocation5 + $0x280] ss:$16 sps:$4 sm:$0xff]   ;;  %v2436_v23 = vld [vmem:[#allocation5 + $0x288] ss:$16 sps:$4 sm:$0xff]  }
  0x54   :  { %v2441_v24 = vld [vmem:[#allocation5 + $0x2a4] ss:$16 sps:$4 sm:$0xff]   ;;  %v2444_v25 = vld [vmem:[#allocation5 + $0x2ac] ss:$16 sps:$4 sm:$0xff]   ;;  %v2439_v26 = vld [vmem:[#allocation5 + $0x2a0] ss:$16 sps:$4 sm:$0xff]  }
  0x55   :  { %1316 = vmatpush1.bf16.msra.mxu0 %v2359_v30  ;;  %1480 = vmatpush1.bf16.msra.mxu1 %v2360_v31  ;;  %v2442_v27 = vld [vmem:[#allocation5 + $0x2a8] ss:$16 sps:$4 sm:$0xff]   ;;  %v2447_v28 = vld [vmem:[#allocation5 + $0x2c4] ss:$16 sps:$4 sm:$0xff]   ;;  %v2450_v29 = vld [vmem:[#allocation5 + $0x2cc] ss:$16 sps:$4 sm:$0xff]  }
  0x56   :  { %1317 = vmatprep.subr.bf16.mxu0 %v2361_v32  ;;  %1481 = vmatprep.subr.bf16.mxu1 %v2363_v33  ;;  %v64_v30 = vld [vmem:[#allocation2 + $0x18] sm:$0xff]  ;;  %v2448_v33 = vld [vmem:[#allocation5 + $0x2c8] ss:$16 sps:$4 sm:$0xff]   ;;  %s1987_s9 = sshll.u32 %s2747_s8, 4  ;;  %s1988_s9 = int_to_ptr.vmem [resolvable:$true] %s1987_s9 }
  0x57   :  { %v2445_v31 = vld [vmem:[#allocation5 + $0x2c0] ss:$16 sps:$4 sm:$0xff]   ;;  %v71_v32 = vpack.c.bf16 %v64_v30, %v64_v30  ;;  %v2471_v46 = vld [vmem:[#allocation5 + $0x344] ss:$16 sps:$4 sm:$0xff]   ;;  %s2711_s10 = scalar_lea.vmem %s1988_s9, 128  ;;  %p2716_p11 = scmp.lt.s32.totalorder %s1988_s9, %s1988_s9 }
  0x58   :  { %v2469_v48 = vld [vmem:[#allocation5 + $0x340] ss:$16 sps:$4 sm:$0xff]   ;;  %v2501_v2 = vld [vmem:[#allocation5 + $0x3e4] ss:$16 sps:$4 sm:$0xff]   ;;  %p2712_p10 = scmp.ne.s32.totalorder %s1988_s9, %s2711_s10  ;;  %p2717_p12 = scmp.lt.s32.totalorder %s2711_s10, %s2711_s10 }
  0x59   :  { %1318 = vmatpush1.bf16.msra.mxu0 %v2365_v34  ;;  %1482 = vmatpush1.bf16.msra.mxu1 %v2366_v35  ;;  %v2453_v34 = vld [vmem:[#allocation5 + $0x2e4] ss:$16 sps:$4 sm:$0xff]   ;;  %v2456_v35 = vld [vmem:[#allocation5 + $0x2ec] ss:$16 sps:$4 sm:$0xff]  }
  0x5a   :  { %1319 = vmatprep.subr.bf16.mxu0 %v2367_v36  ;;  %1483 = vmatprep.subr.bf16.mxu1 %v2369_v37  ;;  %v2451_v36 = vld [vmem:[#allocation5 + $0x2e0] ss:$16 sps:$4 sm:$0xff]   ;;  %v2454_v37 = vld [vmem:[#allocation5 + $0x2e8] ss:$16 sps:$4 sm:$0xff]   ;;  %v2537_v30 = vld [vmem:[#allocation5 + $0x4a4] ss:$16 sps:$4 sm:$0xff]   ;;  %p2718_p13 = por %p2717_p12, %p2716_p11 }
  0x5c   :  { %p2719_p0 = pnand %p2718_p13, %p2712_p10 }
  0x5d   :  { %1320 = vmatpush1.bf16.msra.mxu0 %v2371_v38  ;;  %1484 = vmatpush1.bf16.msra.mxu1 %v2372_v39  ;;  %v2459_v38 = vld [vmem:[#allocation5 + $0x304] ss:$16 sps:$4 sm:$0xff]   ;;  %v2462_v39 = vld [vmem:[#allocation5 + $0x30c] ss:$16 sps:$4 sm:$0xff]  }
  0x5e   :  { %1321 = vmatprep.subr.bf16.mxu0 %v2373_v40  ;;  %1485 = vmatprep.subr.bf16.mxu1 %v2375_v41  ;;  %v2457_v40 = vld [vmem:[#allocation5 + $0x300] ss:$16 sps:$4 sm:$0xff]   ;;  %v2460_v41 = vld [vmem:[#allocation5 + $0x308] ss:$16 sps:$4 sm:$0xff]  }
  0x61   :  { %1322 = vmatpush1.bf16.msra.mxu0 %v2377_v42  ;;  %1486 = vmatpush1.bf16.msra.mxu1 %v2378_v43  ;;  %v2465_v42 = vld [vmem:[#allocation5 + $0x324] ss:$16 sps:$4 sm:$0xff]   ;;  %v2468_v43 = vld [vmem:[#allocation5 + $0x32c] ss:$16 sps:$4 sm:$0xff]  }
  0x62   :  { %1323 = vmatprep.subr.bf16.mxu0 %v2379_v44  ;;  %1487 = vmatprep.subr.bf16.mxu1 %v2381_v45  ;;  %v2463_v44 = vld [vmem:[#allocation5 + $0x320] ss:$16 sps:$4 sm:$0xff]   ;;  %v2466_v45 = vld [vmem:[#allocation5 + $0x328] ss:$16 sps:$4 sm:$0xff]  }
  0x65   :  { %1324 = vmatpush1.bf16.msra.mxu0 %v2383_v47  ;;  %1488 = vmatpush1.bf16.msra.mxu1 %v2384_v49  ;;  %v2474_v47 = vld [vmem:[#allocation5 + $0x34c] ss:$16 sps:$4 sm:$0xff]   ;;  %v2472_v49 = vld [vmem:[#allocation5 + $0x348] ss:$16 sps:$4 sm:$0xff]  }
  0x66   :  { %1325 = vmatprep.subr.bf16.mxu0 %v2385_v50  ;;  %1489 = vmatprep.subr.bf16.mxu1 %v2387_v51  ;;  %v2477_v50 = vld [vmem:[#allocation5 + $0x364] ss:$16 sps:$4 sm:$0xff]   ;;  %v2480_v51 = vld [vmem:[#allocation5 + $0x36c] ss:$16 sps:$4 sm:$0xff]  }
  0x69   :  { %1326 = vmatpush1.bf16.msra.mxu0 %v2389_v52  ;;  %1490 = vmatpush1.bf16.msra.mxu1 %v2390_v53  ;;  %v2475_v52 = vld [vmem:[#allocation5 + $0x360] ss:$16 sps:$4 sm:$0xff]   ;;  %v2478_v53 = vld [vmem:[#allocation5 + $0x368] ss:$16 sps:$4 sm:$0xff]  }
  0x6a   :  { %1327 = vmatprep.subr.bf16.mxu0 %v2391_v54  ;;  %1491 = vmatprep.subr.bf16.mxu1 %v2393_v55  ;;  %v2483_v54 = vld [vmem:[#allocation5 + $0x384] ss:$16 sps:$4 sm:$0xff]   ;;  %v2486_v55 = vld [vmem:[#allocation5 + $0x38c] ss:$16 sps:$4 sm:$0xff]  }
  0x6d   :  { %1328 = vmatpush1.bf16.msra.mxu0 %v2395_v56  ;;  %1492 = vmatpush1.bf16.msra.mxu1 %v2396_v57  ;;  %v2481_v56 = vld [vmem:[#allocation5 + $0x380] ss:$16 sps:$4 sm:$0xff]   ;;  %v2484_v57 = vld [vmem:[#allocation5 + $0x388] ss:$16 sps:$4 sm:$0xff]  }
  0x6e   :  { %1329 = vmatprep.subr.bf16.mxu0 %v2397_v58  ;;  %1493 = vmatprep.subr.bf16.mxu1 %v2399_v59  ;;  %v2489_v58 = vld [vmem:[#allocation5 + $0x3a4] ss:$16 sps:$4 sm:$0xff]   ;;  %v2492_v59 = vld [vmem:[#allocation5 + $0x3ac] ss:$16 sps:$4 sm:$0xff]  }
  0x71   :  { %1330 = vmatpush1.bf16.msra.mxu0 %v2401_v60  ;;  %1494 = vmatpush1.bf16.msra.mxu1 %v2402_v61  ;;  %v2487_v60 = vld [vmem:[#allocation5 + $0x3a0] ss:$16 sps:$4 sm:$0xff]   ;;  %v2490_v61 = vld [vmem:[#allocation5 + $0x3a8] ss:$16 sps:$4 sm:$0xff]  }
  0x72   :  { %1331 = vmatprep.subr.bf16.mxu0 %v2403_v62  ;;  %1495 = vmatprep.subr.bf16.mxu1 %v2405_v63  ;;  %v2495_v62 = vld [vmem:[#allocation5 + $0x3c4] ss:$16 sps:$4 sm:$0xff]   ;;  %v2498_v63 = vld [vmem:[#allocation5 + $0x3cc] ss:$16 sps:$4 sm:$0xff]  }
  0x75   :  { %1332 = vmatpush1.bf16.msra.mxu0 %v2407_v0  ;;  %1496 = vmatpush1.bf16.msra.mxu1 %v2408_v1  ;;  %v2493_v0 = vld [vmem:[#allocation5 + $0x3c0] ss:$16 sps:$4 sm:$0xff]   ;;  %v2496_v1 = vld [vmem:[#allocation5 + $0x3c8] ss:$16 sps:$4 sm:$0xff]  }
  0x76   :  { %1342 = vmatprep.subr.bf16.mxu0 %v2411_v3  ;;  %1506 = vmatprep.subr.bf16.mxu1 %v2414_v4  ;;  %v2504_v3 = vld [vmem:[#allocation5 + $0x3ec] ss:$16 sps:$4 sm:$0xff]   ;;  %v2499_v4 = vld [vmem:[#allocation5 + $0x3e0] ss:$16 sps:$4 sm:$0xff]  }
  0x78   :  { %1334 = vmatmul.mubr.bf16.vlgmr.msra.gmra.mrb[0].mxu0 %v68_v5  ;;  %1498 = vmatmul.mubr.bf16.vlgmr.msra.gmra.mrb[0].mxu1 %v68_v5  ;;  %v2502_v5 = vld [vmem:[#allocation5 + $0x3e8] ss:$16 sps:$4 sm:$0xff]  }
  0x79   :  { %1343 = vmatpush1.bf16.msra.mxu0 %v2409_v6  ;;  %1507 = vmatpush1.bf16.msra.mxu1 %v2412_v7  ;;  %v2507_v6 = vld [vmem:[#allocation5 + $0x404] ss:$16 sps:$4 sm:$0xff]   ;;  %v63_v7 = vld [vmem:[#allocation2 + $0x10] sm:$0xff] }
  0x7a   :  { %1344 = vmatprep.subr.bf16.mxu0 %v2417_v8  ;;  %1508 = vmatprep.subr.bf16.mxu1 %v2420_v9  ;;  %v2510_v8 = vld [vmem:[#allocation5 + $0x40c] ss:$16 sps:$4 sm:$0xff]   ;;  %v2505_v9 = vld [vmem:[#allocation5 + $0x400] ss:$16 sps:$4 sm:$0xff]  }
  0x7b   :  { %1374 = vmatprep.mubr.bf16.mxu0 %v71_v32  ;;  %1538 = vmatprep.mubr.bf16.mxu1 %v71_v32  ;;  %v2535_v32 = vld [vmem:[#allocation5 + $0x4a0] ss:$16 sps:$4 sm:$0xff]  }
  0x7d   :  { %1345 = vmatpush1.bf16.msra.mxu0 %v2415_v10  ;;  %1509 = vmatpush1.bf16.msra.mxu1 %v2418_v11  ;;  %v70_v10 = vpack.c.bf16 %v63_v7, %v63_v7  ;;  %v2508_v11 = vld [vmem:[#allocation5 + $0x408] ss:$16 sps:$4 sm:$0xff]   ;;  %v2600_v7 = vld [vmem:[#allocation5 + $0x5ec] ss:$16 sps:$4 sm:$0xff]  }
  0x7e   :  { %1346 = vmatprep.subr.bf16.mxu0 %v2423_v12  ;;  %1510 = vmatprep.subr.bf16.mxu1 %v2426_v13  ;;  %v2513_v12 = vld [vmem:[#allocation5 + $0x424] ss:$16 sps:$4 sm:$0xff]   ;;  %v2516_v13 = vld [vmem:[#allocation5 + $0x42c] ss:$16 sps:$4 sm:$0xff]  }
  0x81   :  { %1347 = vmatpush1.bf16.msra.mxu0 %v2421_v14  ;;  %1511 = vmatpush1.bf16.msra.mxu1 %v2424_v15  ;;  %v66_v14 = vld [vmem:[#allocation2 + $0x28] sm:$0xff] }
  0x82   :  { %1348 = vmatprep.subr.bf16.mxu0 %v2429_v16  ;;  %1512 = vmatprep.subr.bf16.mxu1 %v2432_v17  ;;  %v73_v15 = vpack.c.bf16 %v66_v14, %v66_v14  ;;  %v2511_v16 = vld [vmem:[#allocation5 + $0x420] ss:$16 sps:$4 sm:$0xff]   ;;  %v2514_v17 = vld [vmem:[#allocation5 + $0x428] ss:$16 sps:$4 sm:$0xff]  }
  0x83   :  { %v2601_v14 = vld [vmem:[#allocation5 + $0x600] ss:$16 sps:$4 sm:$0xff]  }
  0x85   :  { %1349 = vmatpush1.bf16.msra.mxu0 %v2427_v18  ;;  %1513 = vmatpush1.bf16.msra.mxu1 %v2430_v19  ;;  %v2519_v18 = vld [vmem:[#allocation5 + $0x444] ss:$16 sps:$4 sm:$0xff]   ;;  %v2522_v19 = vld [vmem:[#allocation5 + $0x44c] ss:$16 sps:$4 sm:$0xff]  }
  0x86   :  { %1350 = vmatprep.subr.bf16.mxu0 %v2435_v20  ;;  %1514 = vmatprep.subr.bf16.mxu1 %v2438_v21  ;;  %v2517_v20 = vld [vmem:[#allocation5 + $0x440] ss:$16 sps:$4 sm:$0xff]   ;;  %v2520_v21 = vld [vmem:[#allocation5 + $0x448] ss:$16 sps:$4 sm:$0xff]  }
  0x89   :  { %1351 = vmatpush1.bf16.msra.mxu0 %v2433_v22  ;;  %1515 = vmatpush1.bf16.msra.mxu1 %v2436_v23  ;;  %v2525_v22 = vld [vmem:[#allocation5 + $0x464] ss:$16 sps:$4 sm:$0xff]   ;;  %v2528_v23 = vld [vmem:[#allocation5 + $0x46c] ss:$16 sps:$4 sm:$0xff]  }
  0x8a   :  { %1352 = vmatprep.subr.bf16.mxu0 %v2441_v24  ;;  %1516 = vmatprep.subr.bf16.mxu1 %v2444_v25  ;;  %v2523_v24 = vld [vmem:[#allocation5 + $0x460] ss:$16 sps:$4 sm:$0xff]   ;;  %v2526_v25 = vld [vmem:[#allocation5 + $0x468] ss:$16 sps:$4 sm:$0xff]  }
  0x8d   :  { %1353 = vmatpush1.bf16.msra.mxu0 %v2439_v26  ;;  %1517 = vmatpush1.bf16.msra.mxu1 %v2442_v27  ;;  %v2531_v26 = vld [vmem:[#allocation5 + $0x484] ss:$16 sps:$4 sm:$0xff]   ;;  %v2534_v27 = vld [vmem:[#allocation5 + $0x48c] ss:$16 sps:$4 sm:$0xff]  }
  0x8e   :  { %1354 = vmatprep.subr.bf16.mxu0 %v2447_v28  ;;  %1518 = vmatprep.subr.bf16.mxu1 %v2450_v29  ;;  %v2529_v28 = vld [vmem:[#allocation5 + $0x480] ss:$16 sps:$4 sm:$0xff]   ;;  %v2532_v29 = vld [vmem:[#allocation5 + $0x488] ss:$16 sps:$4 sm:$0xff]  }
  0x91   :  { %1355 = vmatpush1.bf16.msra.mxu0 %v2445_v31  ;;  %1519 = vmatpush1.bf16.msra.mxu1 %v2448_v33  ;;  %v2540_v31 = vld [vmem:[#allocation5 + $0x4ac] ss:$16 sps:$4 sm:$0xff]   ;;  %v2538_v33 = vld [vmem:[#allocation5 + $0x4a8] ss:$16 sps:$4 sm:$0xff]  }
  0x92   :  { %1356 = vmatprep.subr.bf16.mxu0 %v2453_v34  ;;  %1520 = vmatprep.subr.bf16.mxu1 %v2456_v35  ;;  %v2543_v34 = vld [vmem:[#allocation5 + $0x4c4] ss:$16 sps:$4 sm:$0xff]   ;;  %v2546_v35 = vld [vmem:[#allocation5 + $0x4cc] ss:$16 sps:$4 sm:$0xff]  }
  0x95   :  { %1357 = vmatpush1.bf16.msra.mxu0 %v2451_v36  ;;  %1521 = vmatpush1.bf16.msra.mxu1 %v2454_v37  ;;  %v2541_v36 = vld [vmem:[#allocation5 + $0x4c0] ss:$16 sps:$4 sm:$0xff]   ;;  %v2544_v37 = vld [vmem:[#allocation5 + $0x4c8] ss:$16 sps:$4 sm:$0xff]  }
  0x96   :  { %1358 = vmatprep.subr.bf16.mxu0 %v2459_v38  ;;  %1522 = vmatprep.subr.bf16.mxu1 %v2462_v39  ;;  %v2549_v38 = vld [vmem:[#allocation5 + $0x4e4] ss:$16 sps:$4 sm:$0xff]   ;;  %v2552_v39 = vld [vmem:[#allocation5 + $0x4ec] ss:$16 sps:$4 sm:$0xff]  }
  0x99   :  { %1359 = vmatpush1.bf16.msra.mxu0 %v2457_v40  ;;  %1523 = vmatpush1.bf16.msra.mxu1 %v2460_v41  ;;  %v2547_v40 = vld [vmem:[#allocation5 + $0x4e0] ss:$16 sps:$4 sm:$0xff]   ;;  %v2550_v41 = vld [vmem:[#allocation5 + $0x4e8] ss:$16 sps:$4 sm:$0xff]  }
  0x9a   :  { %1360 = vmatprep.subr.bf16.mxu0 %v2465_v42  ;;  %1524 = vmatprep.subr.bf16.mxu1 %v2468_v43  ;;  %v2555_v42 = vld [vmem:[#allocation5 + $0x504] ss:$16 sps:$4 sm:$0xff]   ;;  %v2558_v43 = vld [vmem:[#allocation5 + $0x50c] ss:$16 sps:$4 sm:$0xff]  }
  0x9d   :  { %1361 = vmatpush1.bf16.msra.mxu0 %v2463_v44  ;;  %1525 = vmatpush1.bf16.msra.mxu1 %v2466_v45  ;;  %v2553_v44 = vld [vmem:[#allocation5 + $0x500] ss:$16 sps:$4 sm:$0xff]   ;;  %v2556_v45 = vld [vmem:[#allocation5 + $0x508] ss:$16 sps:$4 sm:$0xff]  }
  0x9e   :  { %1362 = vmatprep.subr.bf16.mxu0 %v2471_v46  ;;  %1526 = vmatprep.subr.bf16.mxu1 %v2474_v47  ;;  %v2561_v46 = vld [vmem:[#allocation5 + $0x524] ss:$16 sps:$4 sm:$0xff]   ;;  %v2564_v47 = vld [vmem:[#allocation5 + $0x52c] ss:$16 sps:$4 sm:$0xff]  }
  0xa1   :  { %1363 = vmatpush1.bf16.msra.mxu0 %v2469_v48  ;;  %1527 = vmatpush1.bf16.msra.mxu1 %v2472_v49  ;;  %v2559_v48 = vld [vmem:[#allocation5 + $0x520] ss:$16 sps:$4 sm:$0xff]   ;;  %v2562_v49 = vld [vmem:[#allocation5 + $0x528] ss:$16 sps:$4 sm:$0xff]  }
  0xa2   :  { %1364 = vmatprep.subr.bf16.mxu0 %v2477_v50  ;;  %1528 = vmatprep.subr.bf16.mxu1 %v2480_v51  ;;  %v2567_v50 = vld [vmem:[#allocation5 + $0x544] ss:$16 sps:$4 sm:$0xff]   ;;  %v2570_v51 = vld [vmem:[#allocation5 + $0x54c] ss:$16 sps:$4 sm:$0xff]  }
  0xa5   :  { %1365 = vmatpush1.bf16.msra.mxu0 %v2475_v52  ;;  %1529 = vmatpush1.bf16.msra.mxu1 %v2478_v53  ;;  %v2565_v52 = vld [vmem:[#allocation5 + $0x540] ss:$16 sps:$4 sm:$0xff]   ;;  %v2568_v53 = vld [vmem:[#allocation5 + $0x548] ss:$16 sps:$4 sm:$0xff]  }
  0xa6   :  { %1366 = vmatprep.subr.bf16.mxu0 %v2483_v54  ;;  %1530 = vmatprep.subr.bf16.mxu1 %v2486_v55  ;;  %v2573_v54 = vld [vmem:[#allocation5 + $0x564] ss:$16 sps:$4 sm:$0xff]   ;;  %v2576_v55 = vld [vmem:[#allocation5 + $0x56c] ss:$16 sps:$4 sm:$0xff]  }
  0xa9   :  { %1367 = vmatpush1.bf16.msra.mxu0 %v2481_v56  ;;  %1531 = vmatpush1.bf16.msra.mxu1 %v2484_v57  ;;  %v2571_v56 = vld [vmem:[#allocation5 + $0x560] ss:$16 sps:$4 sm:$0xff]   ;;  %v2574_v57 = vld [vmem:[#allocation5 + $0x568] ss:$16 sps:$4 sm:$0xff]  }
  0xaa   :  { %1368 = vmatprep.subr.bf16.mxu0 %v2489_v58  ;;  %1532 = vmatprep.subr.bf16.mxu1 %v2492_v59  ;;  %v2579_v58 = vld [vmem:[#allocation5 + $0x584] ss:$16 sps:$4 sm:$0xff]   ;;  %v2582_v59 = vld [vmem:[#allocation5 + $0x58c] ss:$16 sps:$4 sm:$0xff]  }
  0xad   :  { %1369 = vmatpush1.bf16.msra.mxu0 %v2487_v60  ;;  %1533 = vmatpush1.bf16.msra.mxu1 %v2490_v61  ;;  %v2577_v60 = vld [vmem:[#allocation5 + $0x580] ss:$16 sps:$4 sm:$0xff]   ;;  %v2580_v61 = vld [vmem:[#allocation5 + $0x588] ss:$16 sps:$4 sm:$0xff]  }
  0xae   :  { %1370 = vmatprep.subr.bf16.mxu0 %v2495_v62  ;;  %1534 = vmatprep.subr.bf16.mxu1 %v2498_v63  ;;  %v2585_v62 = vld [vmem:[#allocation5 + $0x5a4] ss:$16 sps:$4 sm:$0xff]   ;;  %v2588_v63 = vld [vmem:[#allocation5 + $0x5ac] ss:$16 sps:$4 sm:$0xff]  }
  0xb1   :  { %1371 = vmatpush1.bf16.msra.mxu0 %v2493_v0  ;;  %1535 = vmatpush1.bf16.msra.mxu1 %v2496_v1  ;;  %v2583_v0 = vld [vmem:[#allocation5 + $0x5a0] ss:$16 sps:$4 sm:$0xff]   ;;  %v2586_v1 = vld [vmem:[#allocation5 + $0x5a8] ss:$16 sps:$4 sm:$0xff]  }
  0xb2   :  { %1372 = vmatprep.subr.bf16.mxu0 %v2501_v2  ;;  %1536 = vmatprep.subr.bf16.mxu1 %v2504_v3  ;;  %v2591_v2 = vld [vmem:[#allocation5 + $0x5c4] ss:$16 sps:$4 sm:$0xff]   ;;  %v2594_v3 = vld [vmem:[#allocation5 + $0x5cc] ss:$16 sps:$4 sm:$0xff]  }
  0xb5   :  { %1373 = vmatpush1.bf16.msra.mxu0 %v2499_v4  ;;  %1537 = vmatpush1.bf16.msra.mxu1 %v2502_v5  ;;  %v2589_v4 = vld [vmem:[#allocation5 + $0x5c0] ss:$16 sps:$4 sm:$0xff]   ;;  %v2592_v5 = vld [vmem:[#allocation5 + $0x5c8] ss:$16 sps:$4 sm:$0xff]  }
  0xb6   :  { %1383 = vmatprep.subr.bf16.mxu0 %v2507_v6  ;;  %1547 = vmatprep.subr.bf16.mxu1 %v2510_v8  ;;  %v2597_v6 = vld [vmem:[#allocation5 + $0x5e4] ss:$16 sps:$4 sm:$0xff]   ;;  %v2595_v8 = vld [vmem:[#allocation5 + $0x5e0] ss:$16 sps:$4 sm:$0xff]  }
  0xb8   :  { %1375 = vmatmul.mubr.bf16.vlgmr.msra.gmra.mrb[0].mxu0 %v70_v10  ;;  %1539 = vmatmul.mubr.bf16.vlgmr.msra.gmra.mrb[0].mxu1 %v70_v10  ;;  %v65_v10 = vld [vmem:[#allocation2 + $0x20] sm:$0xff] }
  0xb9   :  { %1384 = vmatpush1.bf16.msra.mxu0 %v2505_v9  ;;  %1548 = vmatpush1.bf16.msra.mxu1 %v2508_v11  ;;  %v2598_v9 = vld [vmem:[#allocation5 + $0x5e8] ss:$16 sps:$4 sm:$0xff]   ;;  %v2603_v11 = vld [vmem:[#allocation5 + $0x604] ss:$16 sps:$4 sm:$0xff]  }
  0xba   :  { %1385 = vmatprep.subr.bf16.mxu0 %v2513_v12  ;;  %1549 = vmatprep.subr.bf16.mxu1 %v2516_v13  ;;  %v2606_v12 = vld [vmem:[#allocation5 + $0x60c] ss:$16 sps:$4 sm:$0xff]   ;;  %v72_v13 = vpack.c.bf16 %v65_v10, %v65_v10 }
  0xbb   :  { %1415 = vmatprep.mubr.bf16.mxu0 %v73_v15  ;;  %1579 = vmatprep.mubr.bf16.mxu1 %v73_v15  ;;  %v2604_v15 = vld [vmem:[#allocation5 + $0x608] ss:$16 sps:$4 sm:$0xff]  }
  0xbd   :  { %1386 = vmatpush1.bf16.msra.mxu0 %v2511_v16  ;;  %1550 = vmatpush1.bf16.msra.mxu1 %v2514_v17  ;;  %v2609_v16 = vld [vmem:[#allocation5 + $0x624] ss:$16 sps:$4 sm:$0xff]   ;;  %v2612_v17 = vld [vmem:[#allocation5 + $0x62c] ss:$16 sps:$4 sm:$0xff]  }
  0xbe   :  { %1387 = vmatprep.subr.bf16.mxu0 %v2519_v18  ;;  %1551 = vmatprep.subr.bf16.mxu1 %v2522_v19  ;;  %v2607_v18 = vld [vmem:[#allocation5 + $0x620] ss:$16 sps:$4 sm:$0xff]   ;;  %v2610_v19 = vld [vmem:[#allocation5 + $0x628] ss:$16 sps:$4 sm:$0xff]  }
  0xc1   :  { %1388 = vmatpush1.bf16.msra.mxu0 %v2517_v20  ;;  %1552 = vmatpush1.bf16.msra.mxu1 %v2520_v21  ;;  %v2613_v20 = vld [vmem:[#allocation7 + $0x40] sm:$0xff]  }
  0xc2   :  { %1389 = vmatprep.subr.bf16.mxu0 %v2525_v22  ;;  %1553 = vmatprep.subr.bf16.mxu1 %v2528_v23  ;;  %v2614_v21 = vld [vmem:[#allocation7 + $0xc0] sm:$0xff]   ;;  %v2746_v22 = vmov 0   ;;  %v67_v23 = vld [vmem:[#allocation2 + $0x30] sm:$0xff] }
  0xc5   :  { %1390 = vmatpush1.bf16.msra.mxu0 %v2523_v24  ;;  %1554 = vmatpush1.bf16.msra.mxu1 %v2526_v25  ;;  %v74_v24 = vpack.c.bf16 %v67_v23, %v67_v23  ;;  %v2615_v25 = vld [vmem:[#allocation7] sm:$0xff]  }
  0xc6   :  { %1391 = vmatprep.subr.bf16.mxu0 %v2531_v26  ;;  %1555 = vmatprep.subr.bf16.mxu1 %v2534_v27  ;;  %v2616_v26 = vld [vmem:[#allocation7 + $0x80] sm:$0xff]   ;;  %v2617_v27 = vld [vmem:[#allocation7 + $0x48] sm:$0xff]  }
  0xc9   :  { %1392 = vmatpush1.bf16.msra.mxu0 %v2529_v28  ;;  %1556 = vmatpush1.bf16.msra.mxu1 %v2532_v29  ;;  %v2618_v28 = vld [vmem:[#allocation7 + $0xc8] sm:$0xff]  }
  0xca   :  { %1393 = vmatprep.subr.bf16.mxu0 %v2537_v30  ;;  %1557 = vmatprep.subr.bf16.mxu1 %v2540_v31  ;;  %v2619_v29 = vld [vmem:[#allocation7 + $0x8] sm:$0xff]   ;;  %v2621_v31 = vld [vmem:[#allocation7 + $0x50] sm:$0xff]  }
  0xcb   :  { %v2620_v30 = vld [vmem:[#allocation7 + $0x88] sm:$0xff]  }
  0xcd   :  { %1394 = vmatpush1.bf16.msra.mxu0 %v2535_v32  ;;  %1558 = vmatpush1.bf16.msra.mxu1 %v2538_v33  ;;  %v2622_v32 = vld [vmem:[#allocation7 + $0xd0] sm:$0xff]  }
  0xce   :  { %1395 = vmatprep.subr.bf16.mxu0 %v2543_v34  ;;  %1559 = vmatprep.subr.bf16.mxu1 %v2546_v35  ;;  %v2623_v33 = vld [vmem:[#allocation7 + $0x10] sm:$0xff]   ;;  %v2625_v35 = vld [vmem:[#allocation7 + $0x58] sm:$0xff]  }
  0xcf   :  { %v2624_v34 = vld [vmem:[#allocation7 + $0x90] sm:$0xff]  }
  0xd1   :  { %1396 = vmatpush1.bf16.msra.mxu0 %v2541_v36  ;;  %1560 = vmatpush1.bf16.msra.mxu1 %v2544_v37  ;;  %v2626_v36 = vld [vmem:[#allocation7 + $0xd8] sm:$0xff]  }
  0xd2   :  { %1397 = vmatprep.subr.bf16.mxu0 %v2549_v38  ;;  %1561 = vmatprep.subr.bf16.mxu1 %v2552_v39  ;;  %v2627_v37 = vld [vmem:[#allocation7 + $0x18] sm:$0xff]   ;;  %v2629_v39 = vld [vmem:[#allocation7 + $0x60] sm:$0xff]  }
  0xd3   :  { %v2628_v38 = vld [vmem:[#allocation7 + $0x98] sm:$0xff]  }
  0xd5   :  { %1398 = vmatpush1.bf16.msra.mxu0 %v2547_v40  ;;  %1562 = vmatpush1.bf16.msra.mxu1 %v2550_v41  ;;  %v2630_v40 = vld [vmem:[#allocation7 + $0xe0] sm:$0xff]  }
  0xd6   :  { %1399 = vmatprep.subr.bf16.mxu0 %v2555_v42  ;;  %1563 = vmatprep.subr.bf16.mxu1 %v2558_v43  ;;  %v2631_v41 = vld [vmem:[#allocation7 + $0x20] sm:$0xff]   ;;  %v2633_v43 = vld [vmem:[#allocation7 + $0x68] sm:$0xff]  }
  0xd7   :  { %v2632_v42 = vld [vmem:[#allocation7 + $0xa0] sm:$0xff]  }
  0xd9   :  { %1400 = vmatpush1.bf16.msra.mxu0 %v2553_v44  ;;  %1564 = vmatpush1.bf16.msra.mxu1 %v2556_v45  ;;  %v2634_v44 = vld [vmem:[#allocation7 + $0xe8] sm:$0xff]  }
  0xda   :  { %1401 = vmatprep.subr.bf16.mxu0 %v2561_v46  ;;  %1565 = vmatprep.subr.bf16.mxu1 %v2564_v47  ;;  %v2635_v45 = vld [vmem:[#allocation7 + $0x28] sm:$0xff]   ;;  %v2637_v47 = vld [vmem:[#allocation7 + $0x70] sm:$0xff]  }
  0xdb   :  { %v2636_v46 = vld [vmem:[#allocation7 + $0xa8] sm:$0xff]  }
  0xdd   :  { %1402 = vmatpush1.bf16.msra.mxu0 %v2559_v48  ;;  %1566 = vmatpush1.bf16.msra.mxu1 %v2562_v49  ;;  %v2638_v48 = vld [vmem:[#allocation7 + $0xf0] sm:$0xff]  }
  0xde   :  { %1403 = vmatprep.subr.bf16.mxu0 %v2567_v50  ;;  %1567 = vmatprep.subr.bf16.mxu1 %v2570_v51  ;;  %v2639_v49 = vld [vmem:[#allocation7 + $0x30] sm:$0xff]   ;;  %v2641_v51 = vld [vmem:[#allocation7 + $0x78] sm:$0xff]  }
  0xdf   :  { %v2640_v50 = vld [vmem:[#allocation7 + $0xb0] sm:$0xff]  }
  0xe1   :  { %1404 = vmatpush1.bf16.msra.mxu0 %v2565_v52  ;;  %1568 = vmatpush1.bf16.msra.mxu1 %v2568_v53  ;;  %v2642_v52 = vld [vmem:[#allocation7 + $0xf8] sm:$0xff]  }
  0xe2   :  { %1405 = vmatprep.subr.bf16.mxu0 %v2573_v54  ;;  %1569 = vmatprep.subr.bf16.mxu1 %v2576_v55  ;;  %v2643_v53 = vld [vmem:[#allocation7 + $0x38] sm:$0xff]   ;;  %v277_v55 = vlaneseq }
  0xe3   :  { %v2644_v54 = vld [vmem:[#allocation7 + $0xb8] sm:$0xff]  }
  0xe5   :  { %1406 = vmatpush1.bf16.msra.mxu0 %v2571_v56  ;;  %1570 = vmatpush1.bf16.msra.mxu1 %v2574_v57  ;;  %v278_v56 = vshrl.u32 %v277_v55, 7 }
  0xe6   :  { %1407 = vmatprep.subr.bf16.mxu0 %v2579_v58  ;;  %1571 = vmatprep.subr.bf16.mxu1 %v2582_v59  ;;  %v275_v59 = vld [vmem:[%s2834_s2] sm:$0xf] }
  0xe7   :  { %v279_v57 = vsub.s32 0, %v278_v56  ;;  %v287_v58 = vsub.s32 2, %v278_v56 }
  0xe9   :  { %1408 = vmatpush1.bf16.msra.mxu0 %v2577_v60  ;;  %1572 = vmatpush1.bf16.msra.mxu1 %v2580_v61  ;;  %v283_v60 = vsub.s32 1, %v278_v56  ;;  %v291_v61 = vsub.s32 3, %v278_v56 }
  0xea   :  { %1409 = vmatprep.subr.bf16.mxu0 %v2585_v62  ;;  %1573 = vmatprep.subr.bf16.mxu1 %v2588_v63  ;;  %v280_v62 = vrot.slane %v275_v59, %v279_v57  ;;  %v288_v63 = vrot.slane %v275_v59, %v287_v58 }
  0xed   :  { %1410 = vmatpush1.bf16.msra.mxu0 %v2583_v0  ;;  %1574 = vmatpush1.bf16.msra.mxu1 %v2586_v1  ;;  %v284_v0 = vrot.slane %v275_v59, %v283_v60  ;;  %v292_v1 = vrot.slane %v275_v59, %v291_v61 }
  0xee   :  { %1411 = vmatprep.subr.bf16.mxu0 %v2591_v2  ;;  %1575 = vmatprep.subr.bf16.mxu1 %v2594_v3 }
  0xf1   :  { %1412 = vmatpush1.bf16.msra.mxu0 %v2589_v4  ;;  %1576 = vmatpush1.bf16.msra.mxu1 %v2592_v5 }
  0xf2   :  { %1413 = vmatprep.subr.bf16.mxu0 %v2597_v6  ;;  %1577 = vmatprep.subr.bf16.mxu1 %v2600_v7 }
  0xf5   :  { %1414 = vmatpush1.bf16.msra.mxu0 %v2595_v8  ;;  %1578 = vmatpush1.bf16.msra.mxu1 %v2598_v9 }
  0xf6   :  { %1424 = vmatprep.subr.bf16.mxu0 %v2603_v11  ;;  %1588 = vmatprep.subr.bf16.mxu1 %v2606_v12 }
  0xf8   :  { %1416 = vmatmul.mubr.bf16.vlgmr.msra.gmra.mrb[0].mxu0 %v72_v13  ;;  %1580 = vmatmul.mubr.bf16.vlgmr.msra.gmra.mrb[0].mxu1 %v72_v13 }
  0xf9   :  { %1425 = vmatpush1.bf16.msra.mxu0 %v2601_v14  ;;  %1589 = vmatpush1.bf16.msra.mxu1 %v2604_v15 }
  0xfa   :  { %1426 = vmatprep.subr.bf16.mxu0 %v2609_v16  ;;  %1590 = vmatprep.subr.bf16.mxu1 %v2612_v17 }
  0xfb   :  { %1456 = vmatprep.mubr.bf16.mxu0 %v2746_v22  ;;  %1620 = vmatprep.mubr.bf16.mxu1 %v2746_v22 }
  0xfd   :  { %1427 = vmatpush1.bf16.msra.mxu0 %v2607_v18  ;;  %1591 = vmatpush1.bf16.msra.mxu1 %v2610_v19 }
  0xfe   :  { %2232 = vmatprep.subr.bf16.mxu0 %v2613_v20  ;;  %2254 = vmatprep.subr.bf16.mxu1 %v2614_v21 }
 0x104   :  { %2197 = vmatmul.mubr.msk.bf16.vlgmr.msra.gmra.mrb[0].mxu0 %vm1297_vm0, %v74_v24  ;;  %2198 = vmatmul.mubr.msk.bf16.vlgmr.msra.gmra.mrb[0].mxu1 %vm1297_vm0, %v74_v24  ;;  %v2199_v24 = vld [vmem:[%s2836_s4] ss:$0 sm:$0xff] }
 0x105   :  { %2233 = vmatpush3.bf16.msra.mxu0 %v2615_v25  ;;  %2255 = vmatpush3.bf16.msra.mxu1 %v2616_v26 }
 0x106   :  { %2234 = vmatprep.subr.bf16.mxu0 %v2617_v27  ;;  %2256 = vmatprep.subr.bf16.mxu1 %v2618_v28 }
 0x109   :  { %2235 = vmatpush3.bf16.msra.mxu0 %v2619_v29  ;;  %2257 = vmatpush3.bf16.msra.mxu1 %v2620_v30 }
 0x10a   :  { %2236 = vmatprep.subr.bf16.mxu0 %v2621_v31  ;;  %2258 = vmatprep.subr.bf16.mxu1 %v2622_v32 }
 0x10d   :  { %2237 = vmatpush3.bf16.msra.mxu0 %v2623_v33  ;;  %2259 = vmatpush3.bf16.msra.mxu1 %v2624_v34 }
 0x10e   :  { %2238 = vmatprep.subr.bf16.mxu0 %v2625_v35  ;;  %2260 = vmatprep.subr.bf16.mxu1 %v2626_v36 }
 0x111   :  { %2239 = vmatpush3.bf16.msra.mxu0 %v2627_v37  ;;  %2261 = vmatpush3.bf16.msra.mxu1 %v2628_v38 }
 0x112   :  { %2240 = vmatprep.subr.bf16.mxu0 %v2629_v39  ;;  %2262 = vmatprep.subr.bf16.mxu1 %v2630_v40 }
 0x115   :  { %2241 = vmatpush3.bf16.msra.mxu0 %v2631_v41  ;;  %2263 = vmatpush3.bf16.msra.mxu1 %v2632_v42 }
 0x116   :  { %2242 = vmatprep.subr.bf16.mxu0 %v2633_v43  ;;  %2264 = vmatprep.subr.bf16.mxu1 %v2634_v44 }
 0x119   :  { %2243 = vmatpush3.bf16.msra.mxu0 %v2635_v45  ;;  %2265 = vmatpush3.bf16.msra.mxu1 %v2636_v46 }
 0x11a   :  { %2244 = vmatprep.subr.bf16.mxu0 %v2637_v47  ;;  %2266 = vmatprep.subr.bf16.mxu1 %v2638_v48 }
 0x11d   :  { %2245 = vmatpush3.bf16.msra.mxu0 %v2639_v49  ;;  %2267 = vmatpush3.bf16.msra.mxu1 %v2640_v50 }
 0x11e   :  { %2246 = vmatprep.subr.bf16.mxu0 %v2641_v51  ;;  %2268 = vmatprep.subr.bf16.mxu1 %v2642_v52 }
 0x121   :  { %2247 = vmatpush3.bf16.msra.mxu0 %v2643_v53  ;;  %2269 = vmatpush3.bf16.msra.mxu1 %v2644_v54 }
 0x1d7   :  { %v1458_v2 = vpop.f32.mrb[0].mxu0  ;;  %v1622_v3 = vpop.f32.mrb[0].mxu1 }
 0x1d8   :  { %v2276_v4 = vadd.f32 %v1458_v2, %v280_v62  ;;  %v2278_v5 = vadd.f32 %v1622_v3, %v288_v63  ;;  %v1460_v6 = vpop.f32.mrb[1].mxu0  ;;  %v1624_v7 = vpop.f32.mrb[1].mxu1 }
 0x1d9   :  { %v2277_v8 = vadd.f32 %v1460_v6, %v284_v0  ;;  %v2279_v9 = vadd.f32 %v1624_v7, %v292_v1  ;;  %v1462_v10 = vpop.f32.mrb[2].mxu0  ;;  %v1626_v11 = vpop.f32.mrb[2].mxu1 }
 0x1da   :  { %v1629_v12 = vmax.f32 %v2276_v4, 0.0  ;;  %v1631_v13 = vmax.f32 %v2278_v5, 0.0  ;;  %v1463_v14 = vpop.f32.mrb[3].mxu0  ;;  %v1627_v15 = vpop.f32.mrb[3].mxu1 }
 0x1db   :  { %v1630_v16 = vmax.f32 %v2277_v8, 0.0  ;;  %v1632_v17 = vmax.f32 %v2279_v9, 0.0 }
 0x1dc   :  { %v1633_v20 = vpack.c.bf16 %v1629_v12, %v1629_v12  ;;  %v1635_v21 = vpack.c.bf16 %v1631_v13, %v1631_v13 }
 0x1dd   :  { %v1634_v18 = vpack.c.bf16 %v1630_v16, %v1630_v16  ;;  %v1636_v19 = vpack.c.bf16 %v1632_v17, %v1632_v17 }
 0x1df   :  { %1932 = vmatprep.mubr.bf16.mxu0 %v1634_v18  ;;  %1972 = vmatprep.mubr.bf16.mxu1 %v1636_v19 }
 0x1e0   :  { %1933 = vmatmul.mubr.bf16.vlgmr.msra.gmra.mrb[4].mxu0 %v1633_v20  ;;  %1973 = vmatmul.mubr.bf16.vlgmr.msra.gmra.mrb[4].mxu1 %v1635_v21 }
 0x2b3   :  { %v2248_v22 = vpop.f32.mrb[4].mxu0  ;;  %v2270_v23 = vpop.f32.mrb[4].mxu1 }
 0x2b4   :  { %v2249_v25 = vpop.f32.mrb[5].mxu0  ;;  %v2271_v26 = vpop.f32.mrb[5].mxu1 }
 0x2b5   :  { %v2250_v27 = vadd.f32 %v2249_v25, %v2248_v22  ;;  %v2272_v28 = vadd.f32 %v2271_v26, %v2270_v23  ;;  %v2251_v29 = vpop.f32.mrb[6].mxu0  ;;  %v2273_v30 = vpop.f32.mrb[6].mxu1 }
 0x2b6   :  { %v2252_v31 = vpop.f32.mrb[7].mxu0  ;;  %v2274_v32 = vpop.f32.mrb[7].mxu1 }
 0x2b7   :  { %v1935_v33 = vadd.f32 %v2250_v27, %v2199_v24 }
 0x2b9   :  { %v1975_v34 = vadd.f32 %v2272_v28, %v1935_v33 }
 0x2bb   :  { %1980 = vst [vmem:[#allocation8] sm:$0xff] %v1975_v34 }
 0x2bc   :  { %2722 = shalt.err (!%p2719_p0)
}
 0x2bd   :  { %s2723_s12 = scalar_lea.hbm %s2837_s5, 128 }
 0x2be   :  { %p2724_p1 = scmp.ne.s32.totalorder %s2837_s5, %s2723_s12  ;;  %p2727_p2 = scmp.lt.u32.totalorder %s2723_s12, %s2837_s5 }
 0x2c0   :  { %p2729_p3 = pnand %p2727_p2, %p2724_p1 }
 0x2c2   :  { %2732 = shalt.err (!%p2729_p3)
}
 0x2c3   :  { %1990 = dma.vmem_to_hbm [thread:$0]  %s1988_s9, 128, %s2837_s5, [#allocation4]  }
 0x2c4   :  { %2737 = dma.done.wait [#allocation4], 128  }
 0x2c5   :  { %2738 = vsyncadd [#allocation4], 4294967168 }
 0x2c6   :  { %1994 = vsyncpa [#allocation3], 1 }
 0x2c7   :  { %1995 = vsyncpa [#allocation6], 1 }
 0x2c8   :  { %1996 = vsyncpa [#allocation4], 1 }

</bundles_post_ra>
